<compile_context>
chip_gen: v6e
topology: v6e:2x2x1
jax: 0.10.0
libtpu: 0.0.40
codegen_flags: <defaults>
</compile_context>

<pallas_src>
import functools

import jax
import jax.numpy as jnp
from jax.experimental import pallas as pl
from jax.experimental.pallas import tpu as pltpu


def _encoder_block_kernel(
    xq_ref,           # (1, TQ, E)  query rows of this tile
    xf_ref,           # (1, S, E)   full sequence (source of K / V)
    wq_ref,           # (E, E)      Wq^T   (pre-transposed in wrapper)
    wk_ref,           # (E, E)      Wk^T
    wv_ref,           # (E, E)      Wv^T
    bq_ref,           # (1, E)
    bk_ref,           # (1, E)
    bv_ref,           # (1, E)
    woh_ref,          # (H, D, E)   Wo^T split per head
    bo_ref,           # (1, E)
    g1_ref, be1_ref,  # (1, E)      norm1 weight / bias
    w1_ref,           # (E, F)      ff[0].weight^T
    b1_ref,           # (1, F)
    w2_ref,           # (F, E)      ff[2].weight^T
    b2_ref,           # (1, E)
    g2_ref, be2_ref,  # (1, E)      norm2 weight / bias
    o_ref,            # (1, TQ, E)
    *,
    num_heads: int,
    embed_dim: int,
):
    eps = 1e-5
    f32 = jnp.float32
    E = embed_dim
    H = num_heads
    D = E // H
    scale = 1.0 / (D ** 0.5)

    xq = xq_ref[0]                                     # (TQ, E)
    xf = xf_ref[0]                                     # (S,  E)

    # ---- QKV projections (weights already transposed; no .T in kernel) ---
    q = jnp.dot(xq, wq_ref[...], preferred_element_type=f32) + bq_ref[0].astype(f32)
    k = jnp.dot(xf, wk_ref[...], preferred_element_type=f32) + bk_ref[0].astype(f32)
    v = jnp.dot(xf, wv_ref[...], preferred_element_type=f32) + bv_ref[0].astype(f32)

    # ---- multi-head attention + fused output projection -------------------
    # concat(heads) @ Wo^T  ==  sum_h head_h @ Wo^T[h*D:(h+1)*D, :]
    attn = None
    for h in range(H):
        qh = q[:, h * D:(h + 1) * D]                   # (TQ, D)
        kh = k[:, h * D:(h + 1) * D]                   # (S,  D)
        vh = v[:, h * D:(h + 1) * D]                   # (S,  D)
        # q_h @ k_h^T without materializing a transpose (trans_b via dot_general).
        s = jax.lax.dot_general(
            qh, kh, (((1,), (1,)), ((), ())),
            preferred_element_type=f32) * scale        # (TQ, S)
        s = s - jnp.max(s, axis=-1, keepdims=True)
        p = jnp.exp(s)
        p = p * pl.reciprocal(jnp.sum(p, axis=-1, keepdims=True), approx=True)
        oh = jnp.dot(p, vh, preferred_element_type=f32)                 # (TQ, D)
        contrib = jnp.dot(oh, woh_ref[h], preferred_element_type=f32)   # (TQ, E)
        attn = contrib if attn is None else attn + contrib
    attn = attn + bo_ref[0].astype(f32)

    # ---- residual + LayerNorm 1 (dropout1 == identity) --------------------
    x1 = xq.astype(f32) + attn
    mu1 = jnp.mean(x1, axis=-1, keepdims=True)
    var1 = jnp.mean(jnp.square(x1 - mu1), axis=-1, keepdims=True)
    x1n = (x1 - mu1) * jax.lax.rsqrt(var1 + eps)
    x1n = x1n * g1_ref[0].astype(f32) + be1_ref[0].astype(f32)

    # ---- feed-forward: Linear -> ReLU -> Linear ----------------------------
    hdn = jnp.dot(x1n, w1_ref[...], preferred_element_type=f32) + b1_ref[0].astype(f32)
    hdn = jnp.maximum(hdn, 0.0)
    ff = jnp.dot(hdn, w2_ref[...], preferred_element_type=f32) + b2_ref[0].astype(f32)

    # ---- residual + LayerNorm 2 (dropout2 == identity) ---------------------
    x2 = x1n + ff
    mu2 = jnp.mean(x2, axis=-1, keepdims=True)
    var2 = jnp.mean(jnp.square(x2 - mu2), axis=-1, keepdims=True)
    x2n = (x2 - mu2) * jax.lax.rsqrt(var2 + eps)
    x2n = x2n * g2_ref[0].astype(f32) + be2_ref[0].astype(f32)

    o_ref[0] = x2n.astype(o_ref.dtype)


def _pick_q_tile(S, max_tile=256):
    """Largest multiple-of-8 divisor of S that is <= max_tile (else full S)."""
    if S <= max_tile:
        return S
    for t in range(max_tile, 7, -1):
        if S % t == 0 and t % 8 == 0:
            return t
    return S


def transformer_encoder_block(x, params, *, num_heads, q_tile=None):
    B, S, E = x.shape
    H = num_heads
    D = E // H
    Fdim = params["w1"].shape[0]

    TQ = q_tile if q_tile is not None else _pick_q_tile(S)
    assert S % TQ == 0
    nt = S // TQ

    # ---- one-time weight re-layout outside the kernel (reused B*nt times) --
    wqkv = params["wqkv"]                      # (3E, E), torch in_proj layout
    wq_t = wqkv[0 * E:1 * E, :].T              # (E, E)
    wk_t = wqkv[1 * E:2 * E, :].T
    wv_t = wqkv[2 * E:3 * E, :].T
    bq = params["bqkv"][:, 0 * E:1 * E]        # (1, E)
    bk = params["bqkv"][:, 1 * E:2 * E]
    bv = params["bqkv"][:, 2 * E:3 * E]
    wo_h = params["wo"].T.reshape(H, D, E)     # Wo^T split per head
    w1_t = params["w1"].T                      # (E, F)
    w2_t = params["w2"].T                      # (F, E)

    weight_args = (wq_t, wk_t, wv_t, bq, bk, bv, wo_h, params["bo"],
                   params["g1"], params["be1"], w1_t, params["b1"],
                   w2_t, params["b2"], params["g2"], params["be2"])

    # ---- VMEM budget (double-buffered ins/outs + f32 intermediates) --------
    itm = x.dtype.itemsize
    weight_bytes = sum(int(a.size) * a.dtype.itemsize for a in weight_args)
    act_bytes = (TQ * E + S * E + TQ * E) * itm
    inter_bytes = 4 * (3 * TQ * E + 2 * S * E + TQ * S + TQ * Fdim + 6 * TQ * E)
    vmem_limit = int(min(64 * 1024 * 1024,
                         2 * (weight_bytes + act_bytes) + inter_bytes
                         + 16 * 1024 * 1024))

    flops = B * (2 * S * E * E                 # Q projection (all q tiles)
                 + nt * 2 * (2 * S * E * E)    # K/V projection (per q tile)
                 + 2 * 2 * S * S * E           # QK^T + PV
                 + 2 * S * E * E               # output projection
                 + 2 * 2 * S * E * Fdim)       # FFN
    cost = pl.CostEstimate(
        flops=int(flops),
        transcendentals=int(B * H * S * S),
        bytes_accessed=int((1 + nt) * B * S * E * itm     # x (q tiles + full seq)
                           + B * S * E * itm              # output
                           + weight_bytes),
    )

    kernel = functools.partial(_encoder_block_kernel, num_heads=H, embed_dim=E)

    def _const_spec(shape):
        if len(shape) == 2:
            return pl.BlockSpec(shape, lambda b, qi: (0, 0))
        return pl.BlockSpec(shape, lambda b, qi: (0, 0, 0))

    return pl.pallas_call(
        kernel,
        out_shape=jax.ShapeDtypeStruct((B, S, E), x.dtype),
        grid_spec=pltpu.PrefetchScalarGridSpec(
            num_scalar_prefetch=0,
            grid=(B, nt),
            in_specs=[
                pl.BlockSpec((1, TQ, E), lambda b, qi: (b, qi, 0)),  # query rows
                pl.BlockSpec((1, S, E), lambda b, qi: (b, 0, 0)),    # full seq (K/V)
                _const_spec((E, E)),      # wq_t
                _const_spec((E, E)),      # wk_t
                _const_spec((E, E)),      # wv_t
                _const_spec((1, E)),      # bq
                _const_spec((1, E)),      # bk
                _const_spec((1, E)),      # bv
                _const_spec((H, D, E)),   # wo per head
                _const_spec((1, E)),      # bo
                _const_spec((1, E)),      # norm1 gamma
                _const_spec((1, E)),      # norm1 beta
                _const_spec((E, Fdim)),   # w1_t
                _const_spec((1, Fdim)),   # b1
                _const_spec((Fdim, E)),   # w2_t
                _const_spec((1, E)),      # b2
                _const_spec((1, E)),      # norm2 gamma
                _const_spec((1, E)),      # norm2 beta
            ],
            out_specs=pl.BlockSpec((1, TQ, E), lambda b, qi: (b, qi, 0)),
        ),
        compiler_params=pltpu.CompilerParams(
            dimension_semantics=("parallel", "parallel"),
            vmem_limit_bytes=vmem_limit),
        cost_estimate=cost,
    )(
        x, x,
        wq_t, wk_t, wv_t, bq, bk, bv,
        wo_h, params["bo"],
        params["g1"], params["be1"],
        w1_t, params["b1"], w2_t, params["b2"],
        params["g2"], params["be2"],
    )


def _reference(x, params, num_heads):
    """Pure-JAX reference mirroring torch semantics (eval mode)."""
    B, S, E = x.shape
    H, D = num_heads, E // num_heads
    eps = 1e-5

    qkv = jnp.einsum("bse,fe->bsf", x, params["wqkv"]) + params["bqkv"][0]
    q, k, v = jnp.split(qkv, 3, axis=-1)
    q = q.reshape(B, S, H, D).transpose(0, 2, 1, 3)
    k = k.reshape(B, S, H, D).transpose(0, 2, 1, 3)
    v = v.reshape(B, S, H, D).transpose(0, 2, 1, 3)
    s = jnp.einsum("bhqd,bhkd->bhqk", q, k) / (D ** 0.5)
    p = jax.nn.softmax(s, axis=-1)
    a = jnp.einsum("bhqk,bhkd->bhqd", p, v).transpose(0, 2, 1, 3).reshape(B, S, E)
    a = jnp.einsum("bse,fe->bsf", a, params["wo"]) + params["bo"][0]

    def ln(y, g, b):
        mu = y.mean(-1, keepdims=True)
        var = ((y - mu) ** 2).mean(-1, keepdims=True)
        return (y - mu) / jnp.sqrt(var + eps) * g[0] + b[0]

    x1 = ln(x + a, params["g1"], params["be1"])
    h = jnp.maximum(jnp.einsum("bse,fe->bsf", x1, params["w1"]) + params["b1"][0], 0.0)
    ff = jnp.einsum("bsf,ef->bse", h, params["w2"]) + params["b2"][0]
    return ln(x1 + ff, params["g2"], params["be2"])


if __name__ == "__main__":
    # Small shapes: batch=2, seq=8, embed_dim=32, heads=4, expansion=4
    B, S, E, H, EXP = 2, 8, 32, 4, 4
    Fdim = EXP * E

    key = jax.random.PRNGKey(0)
    ks = jax.random.split(key, 12)

    params = {
        "wqkv": 0.1 * jax.random.normal(ks[0], (3 * E, E), jnp.float32),
        "bqkv": 0.1 * jax.random.normal(ks[1], (1, 3 * E), jnp.float32),
        "wo":   0.1 * jax.random.normal(ks[2], (E, E), jnp.float32),
        "bo":   0.1 * jax.random.normal(ks[3], (1, E), jnp.float32),
        "g1":   1.0 + 0.1 * jax.random.normal(ks[4], (1, E), jnp.float32),
        "be1":  0.1 * jax.random.normal(ks[5], (1, E), jnp.float32),
        "w1":   0.1 * jax.random.normal(ks[6], (Fdim, E), jnp.float32),
        "b1":   0.1 * jax.random.normal(ks[7], (1, Fdim), jnp.float32),
        "w2":   0.1 * jax.random.normal(ks[8], (E, Fdim), jnp.float32),
        "b2":   0.1 * jax.random.normal(ks[9], (1, E), jnp.float32),
        "g2":   1.0 + 0.1 * jax.random.normal(ks[10], (1, E), jnp.float32),
        "be2":  0.1 * jax.random.normal(ks[11], (1, E), jnp.float32),
    }

    x = jax.random.normal(jax.random.PRNGKey(42), (B, S, E), jnp.float32)

    out = transformer_encoder_block(x, params, num_heads=H)
    out = jax.block_until_ready(out)

    ref = _reference(x, params, H)
    assert out.shape == (B, S, E)
    # Tolerance relaxed vs 1e-4 because the softmax denominator uses the EUP
    # approx reciprocal (per perf review); errors remain O(1e-4 .. 1e-3).
    assert jnp.allclose(out, ref, atol=5e-3, rtol=5e-3), (
        f"max abs err {jnp.max(jnp.abs(out - ref))}")

    print("KERNEL_OK")
</pallas_src>

<mosaic_0001>
module attributes {stable_mosaic.version = 11 : i64} {
  func.func @_encoder_block_kernel(%arg0: i32, %arg1: i32, %arg2: memref<1x8x32xf32, #tpu.memory_space<vmem>>, %arg3: memref<1x8x32xf32, #tpu.memory_space<vmem>>, %arg4: memref<32x32xf32, #tpu.memory_space<vmem>>, %arg5: memref<32x32xf32, #tpu.memory_space<vmem>>, %arg6: memref<32x32xf32, #tpu.memory_space<vmem>>, %arg7: memref<1x32xf32, #tpu.memory_space<vmem>>, %arg8: memref<1x32xf32, #tpu.memory_space<vmem>>, %arg9: memref<1x32xf32, #tpu.memory_space<vmem>>, %arg10: memref<4x8x32xf32, #tpu.memory_space<vmem>>, %arg11: memref<1x32xf32, #tpu.memory_space<vmem>>, %arg12: memref<1x32xf32, #tpu.memory_space<vmem>>, %arg13: memref<1x32xf32, #tpu.memory_space<vmem>>, %arg14: memref<32x128xf32, #tpu.memory_space<vmem>>, %arg15: memref<1x128xf32, #tpu.memory_space<vmem>>, %arg16: memref<128x32xf32, #tpu.memory_space<vmem>>, %arg17: memref<1x32xf32, #tpu.memory_space<vmem>>, %arg18: memref<1x32xf32, #tpu.memory_space<vmem>>, %arg19: memref<1x32xf32, #tpu.memory_space<vmem>>, %arg20: memref<1x8x32xf32, #tpu.memory_space<vmem>>) attributes {dimension_semantics = [#tpu.dimension_semantics<parallel>, #tpu.dimension_semantics<parallel>], iteration_bounds = array<i64: 2, 1>, scalar_prefetch = 0 : i64, scratch_operands = 0 : i64, tpu.core_type = #tpu.core_type<tc>, window_params = [{transform_indices = @transform_0, window_bounds = array<i64: 1, 8, 32>}, {transform_indices = @transform_1, window_bounds = array<i64: 1, 8, 32>}, {pipeline_mode = #tpu.pipeline_mode<synchronous>, transform_indices = @transform_2, window_bounds = array<i64: 32, 32>}, {pipeline_mode = #tpu.pipeline_mode<synchronous>, transform_indices = @transform_3, window_bounds = array<i64: 32, 32>}, {pipeline_mode = #tpu.pipeline_mode<synchronous>, transform_indices = @transform_4, window_bounds = array<i64: 32, 32>}, {pipeline_mode = #tpu.pipeline_mode<synchronous>, transform_indices = @transform_5, window_bounds = array<i64: 1, 32>}, {pipeline_mode = #tpu.pipeline_mode<synchronous>, transform_indices = @transform_6, window_bounds = array<i64: 1, 32>}, {pipeline_mode = #tpu.pipeline_mode<synchronous>, transform_indices = @transform_7, window_bounds = array<i64: 1, 32>}, {pipeline_mode = #tpu.pipeline_mode<synchronous>, transform_indices = @transform_8, window_bounds = array<i64: 4, 8, 32>}, {pipeline_mode = #tpu.pipeline_mode<synchronous>, transform_indices = @transform_9, window_bounds = array<i64: 1, 32>}, {pipeline_mode = #tpu.pipeline_mode<synchronous>, transform_indices = @transform_10, window_bounds = array<i64: 1, 32>}, {pipeline_mode = #tpu.pipeline_mode<synchronous>, transform_indices = @transform_11, window_bounds = array<i64: 1, 32>}, {pipeline_mode = #tpu.pipeline_mode<synchronous>, transform_indices = @transform_12, window_bounds = array<i64: 32, 128>}, {pipeline_mode = #tpu.pipeline_mode<synchronous>, transform_indices = @transform_13, window_bounds = array<i64: 1, 128>}, {pipeline_mode = #tpu.pipeline_mode<synchronous>, transform_indices = @transform_14, window_bounds = array<i64: 128, 32>}, {pipeline_mode = #tpu.pipeline_mode<synchronous>, transform_indices = @transform_15, window_bounds = array<i64: 1, 32>}, {pipeline_mode = #tpu.pipeline_mode<synchronous>, transform_indices = @transform_16, window_bounds = array<i64: 1, 32>}, {pipeline_mode = #tpu.pipeline_mode<synchronous>, transform_indices = @transform_17, window_bounds = array<i64: 1, 32>}, {transform_indices = @transform_18, window_bounds = array<i64: 1, 8, 32>}]} {
    %c0 = arith.constant 0 : index
    %c0_0 = arith.constant 0 : index
    %c0_1 = arith.constant 0 : index
    %0 = vector.load %arg2[%c0, %c0_0, %c0_1] : memref<1x8x32xf32, #tpu.memory_space<vmem>>, vector<1x8x32xf32>
    %1 = vector.shape_cast %0 : vector<1x8x32xf32> to vector<8x32xf32>
    %c0_2 = arith.constant 0 : index
    %c0_3 = arith.constant 0 : index
    %c0_4 = arith.constant 0 : index
    %2 = vector.load %arg3[%c0_2, %c0_3, %c0_4] : memref<1x8x32xf32, #tpu.memory_space<vmem>>, vector<1x8x32xf32>
    %3 = vector.shape_cast %2 : vector<1x8x32xf32> to vector<8x32xf32>
    %c0_5 = arith.constant 0 : index
    %c0_6 = arith.constant 0 : index
    %4 = vector.load %arg4[%c0_5, %c0_6] : memref<32x32xf32, #tpu.memory_space<vmem>>, vector<32x32xf32>
    %cst = arith.constant dense<0.000000e+00> : vector<8x32xf32>
    %5 = tpu.matmul %1, %4, %cst {dimension_numbers = #tpu.dot_dimension_numbers<[1], [0], [0], [1], [0, 0, 1, 1], [], []>} : vector<8x32xf32>, vector<32x32xf32>, vector<8x32xf32> -> vector<8x32xf32>
    %c0_7 = arith.constant 0 : index
    %c0_8 = arith.constant 0 : index
    %6 = vector.load %arg7[%c0_7, %c0_8] : memref<1x32xf32, #tpu.memory_space<vmem>>, vector<1x32xf32>
    %7 = vector.shape_cast %6 : vector<1x32xf32> to vector<32xf32>
    %8 = vector.shape_cast %7 : vector<32xf32> to vector<1x32xf32>
    %9 = vector.broadcast %8 : vector<1x32xf32> to vector<8x32xf32>
    %10 = arith.addf %5, %9 : vector<8x32xf32>
    %c0_9 = arith.constant 0 : index
    %c0_10 = arith.constant 0 : index
    %11 = vector.load %arg5[%c0_9, %c0_10] : memref<32x32xf32, #tpu.memory_space<vmem>>, vector<32x32xf32>
    %cst_11 = arith.constant dense<0.000000e+00> : vector<8x32xf32>
    %12 = tpu.matmul %3, %11, %cst_11 {dimension_numbers = #tpu.dot_dimension_numbers<[1], [0], [0], [1], [0, 0, 1, 1], [], []>} : vector<8x32xf32>, vector<32x32xf32>, vector<8x32xf32> -> vector<8x32xf32>
    %c0_12 = arith.constant 0 : index
    %c0_13 = arith.constant 0 : index
    %13 = vector.load %arg8[%c0_12, %c0_13] : memref<1x32xf32, #tpu.memory_space<vmem>>, vector<1x32xf32>
    %14 = vector.shape_cast %13 : vector<1x32xf32> to vector<32xf32>
    %15 = vector.shape_cast %14 : vector<32xf32> to vector<1x32xf32>
    %16 = vector.broadcast %15 : vector<1x32xf32> to vector<8x32xf32>
    %17 = arith.addf %12, %16 : vector<8x32xf32>
    %c0_14 = arith.constant 0 : index
    %c0_15 = arith.constant 0 : index
    %18 = vector.load %arg6[%c0_14, %c0_15] : memref<32x32xf32, #tpu.memory_space<vmem>>, vector<32x32xf32>
    %cst_16 = arith.constant dense<0.000000e+00> : vector<8x32xf32>
    %19 = tpu.matmul %3, %18, %cst_16 {dimension_numbers = #tpu.dot_dimension_numbers<[1], [0], [0], [1], [0, 0, 1, 1], [], []>} : vector<8x32xf32>, vector<32x32xf32>, vector<8x32xf32> -> vector<8x32xf32>
    %c0_17 = arith.constant 0 : index
    %c0_18 = arith.constant 0 : index
    %20 = vector.load %arg9[%c0_17, %c0_18] : memref<1x32xf32, #tpu.memory_space<vmem>>, vector<1x32xf32>
    %21 = vector.shape_cast %20 : vector<1x32xf32> to vector<32xf32>
    %22 = vector.shape_cast %21 : vector<32xf32> to vector<1x32xf32>
    %23 = vector.broadcast %22 : vector<1x32xf32> to vector<8x32xf32>
    %24 = arith.addf %19, %23 : vector<8x32xf32>
    %25 = vector.extract_strided_slice %10 {offsets = [0, 0], sizes = [8, 8], strides = [1, 1]} : vector<8x32xf32> to vector<8x8xf32>
    %26 = vector.extract_strided_slice %17 {offsets = [0, 0], sizes = [8, 8], strides = [1, 1]} : vector<8x32xf32> to vector<8x8xf32>
    %27 = vector.extract_strided_slice %24 {offsets = [0, 0], sizes = [8, 8], strides = [1, 1]} : vector<8x32xf32> to vector<8x8xf32>
    %cst_19 = arith.constant dense<0.000000e+00> : vector<8x8xf32>
    %28 = tpu.matmul %25, %26, %cst_19 {dimension_numbers = #tpu.dot_dimension_numbers<[1], [1], [0], [0], [0, 0, 1, 0], [], []>} : vector<8x8xf32>, vector<8x8xf32>, vector<8x8xf32> -> vector<8x8xf32>
    %cst_20 = arith.constant 0.353553385 : f32
    %29 = vector.broadcast %cst_20 : f32 to vector<8x8xf32>
    %30 = arith.mulf %28, %29 : vector<8x8xf32>
    %cst_21 = arith.constant dense<0xFF800000> : vector<8xf32>
    %31 = vector.multi_reduction <maximumf>, %30, %cst_21 [1] : vector<8x8xf32> to vector<8xf32>
    %32 = vector.shape_cast %31 : vector<8xf32> to vector<8x1xf32>
    %33 = vector.broadcast %32 : vector<8x1xf32> to vector<8x8xf32>
    %34 = arith.subf %30, %33 : vector<8x8xf32>
    %35 = math.exp %34 : vector<8x8xf32>
    %cst_22 = arith.constant dense<0.000000e+00> : vector<8xf32>
    %36 = vector.multi_reduction <add>, %35, %cst_22 [1] : vector<8x8xf32> to vector<8xf32>
    %37 = vector.shape_cast %36 : vector<8xf32> to vector<8x1xf32>
    %38 = tpu.reciprocal %37 {approx = true} : vector<8x1xf32> -> vector<8x1xf32>
    %39 = vector.broadcast %38 : vector<8x1xf32> to vector<8x8xf32>
    %40 = arith.mulf %35, %39 : vector<8x8xf32>
    %cst_23 = arith.constant dense<0.000000e+00> : vector<8x8xf32>
    %41 = tpu.matmul %40, %27, %cst_23 {dimension_numbers = #tpu.dot_dimension_numbers<[1], [0], [0], [1], [0, 0, 1, 1], [], []>} : vector<8x8xf32>, vector<8x8xf32>, vector<8x8xf32> -> vector<8x8xf32>
    %c0_24 = arith.constant 0 : index
    %c0_25 = arith.constant 0 : index
    %c0_26 = arith.constant 0 : index
    %42 = vector.load %arg10[%c0_24, %c0_25, %c0_26] : memref<4x8x32xf32, #tpu.memory_space<vmem>>, vector<1x8x32xf32>
    %43 = vector.shape_cast %42 : vector<1x8x32xf32> to vector<8x32xf32>
    %cst_27 = arith.constant dense<0.000000e+00> : vector<8x32xf32>
    %44 = tpu.matmul %41, %43, %cst_27 {dimension_numbers = #tpu.dot_dimension_numbers<[1], [0], [0], [1], [0, 0, 1, 1], [], []>} : vector<8x8xf32>, vector<8x32xf32>, vector<8x32xf32> -> vector<8x32xf32>
    %45 = vector.extract_strided_slice %10 {offsets = [0, 8], sizes = [8, 8], strides = [1, 1]} : vector<8x32xf32> to vector<8x8xf32>
    %46 = vector.extract_strided_slice %17 {offsets = [0, 8], sizes = [8, 8], strides = [1, 1]} : vector<8x32xf32> to vector<8x8xf32>
    %47 = vector.extract_strided_slice %24 {offsets = [0, 8], sizes = [8, 8], strides = [1, 1]} : vector<8x32xf32> to vector<8x8xf32>
    %cst_28 = arith.constant dense<0.000000e+00> : vector<8x8xf32>
    %48 = tpu.matmul %45, %46, %cst_28 {dimension_numbers = #tpu.dot_dimension_numbers<[1], [1], [0], [0], [0, 0, 1, 0], [], []>} : vector<8x8xf32>, vector<8x8xf32>, vector<8x8xf32> -> vector<8x8xf32>
    %cst_29 = arith.constant 0.353553385 : f32
    %49 = vector.broadcast %cst_29 : f32 to vector<8x8xf32>
    %50 = arith.mulf %48, %49 : vector<8x8xf32>
    %cst_30 = arith.constant dense<0xFF800000> : vector<8xf32>
    %51 = vector.multi_reduction <maximumf>, %50, %cst_30 [1] : vector<8x8xf32> to vector<8xf32>
    %52 = vector.shape_cast %51 : vector<8xf32> to vector<8x1xf32>
    %53 = vector.broadcast %52 : vector<8x1xf32> to vector<8x8xf32>
    %54 = arith.subf %50, %53 : vector<8x8xf32>
    %55 = math.exp %54 : vector<8x8xf32>
    %cst_31 = arith.constant dense<0.000000e+00> : vector<8xf32>
    %56 = vector.multi_reduction <add>, %55, %cst_31 [1] : vector<8x8xf32> to vector<8xf32>
    %57 = vector.shape_cast %56 : vector<8xf32> to vector<8x1xf32>
    %58 = tpu.reciprocal %57 {approx = true} : vector<8x1xf32> -> vector<8x1xf32>
    %59 = vector.broadcast %58 : vector<8x1xf32> to vector<8x8xf32>
    %60 = arith.mulf %55, %59 : vector<8x8xf32>
    %cst_32 = arith.constant dense<0.000000e+00> : vector<8x8xf32>
    %61 = tpu.matmul %60, %47, %cst_32 {dimension_numbers = #tpu.dot_dimension_numbers<[1], [0], [0], [1], [0, 0, 1, 1], [], []>} : vector<8x8xf32>, vector<8x8xf32>, vector<8x8xf32> -> vector<8x8xf32>
    %c1 = arith.constant 1 : index
    %c0_33 = arith.constant 0 : index
    %c0_34 = arith.constant 0 : index
    %62 = vector.load %arg10[%c1, %c0_33, %c0_34] : memref<4x8x32xf32, #tpu.memory_space<vmem>>, vector<1x8x32xf32>
    %63 = vector.shape_cast %62 : vector<1x8x32xf32> to vector<8x32xf32>
    %cst_35 = arith.constant dense<0.000000e+00> : vector<8x32xf32>
    %64 = tpu.matmul %61, %63, %cst_35 {dimension_numbers = #tpu.dot_dimension_numbers<[1], [0], [0], [1], [0, 0, 1, 1], [], []>} : vector<8x8xf32>, vector<8x32xf32>, vector<8x32xf32> -> vector<8x32xf32>
    %65 = arith.addf %44, %64 : vector<8x32xf32>
    %66 = vector.extract_strided_slice %10 {offsets = [0, 16], sizes = [8, 8], strides = [1, 1]} : vector<8x32xf32> to vector<8x8xf32>
    %67 = vector.extract_strided_slice %17 {offsets = [0, 16], sizes = [8, 8], strides = [1, 1]} : vector<8x32xf32> to vector<8x8xf32>
    %68 = vector.extract_strided_slice %24 {offsets = [0, 16], sizes = [8, 8], strides = [1, 1]} : vector<8x32xf32> to vector<8x8xf32>
    %cst_36 = arith.constant dense<0.000000e+00> : vector<8x8xf32>
    %69 = tpu.matmul %66, %67, %cst_36 {dimension_numbers = #tpu.dot_dimension_numbers<[1], [1], [0], [0], [0, 0, 1, 0], [], []>} : vector<8x8xf32>, vector<8x8xf32>, vector<8x8xf32> -> vector<8x8xf32>
    %cst_37 = arith.constant 0.353553385 : f32
    %70 = vector.broadcast %cst_37 : f32 to vector<8x8xf32>
    %71 = arith.mulf %69, %70 : vector<8x8xf32>
    %cst_38 = arith.constant dense<0xFF800000> : vector<8xf32>
    %72 = vector.multi_reduction <maximumf>, %71, %cst_38 [1] : vector<8x8xf32> to vector<8xf32>
    %73 = vector.shape_cast %72 : vector<8xf32> to vector<8x1xf32>
    %74 = vector.broadcast %73 : vector<8x1xf32> to vector<8x8xf32>
    %75 = arith.subf %71, %74 : vector<8x8xf32>
    %76 = math.exp %75 : vector<8x8xf32>
    %cst_39 = arith.constant dense<0.000000e+00> : vector<8xf32>
    %77 = vector.multi_reduction <add>, %76, %cst_39 [1] : vector<8x8xf32> to vector<8xf32>
    %78 = vector.shape_cast %77 : vector<8xf32> to vector<8x1xf32>
    %79 = tpu.reciprocal %78 {approx = true} : vector<8x1xf32> -> vector<8x1xf32>
    %80 = vector.broadcast %79 : vector<8x1xf32> to vector<8x8xf32>
    %81 = arith.mulf %76, %80 : vector<8x8xf32>
    %cst_40 = arith.constant dense<0.000000e+00> : vector<8x8xf32>
    %82 = tpu.matmul %81, %68, %cst_40 {dimension_numbers = #tpu.dot_dimension_numbers<[1], [0], [0], [1], [0, 0, 1, 1], [], []>} : vector<8x8xf32>, vector<8x8xf32>, vector<8x8xf32> -> vector<8x8xf32>
    %c2 = arith.constant 2 : index
    %c0_41 = arith.constant 0 : index
    %c0_42 = arith.constant 0 : index
    %83 = vector.load %arg10[%c2, %c0_41, %c0_42] : memref<4x8x32xf32, #tpu.memory_space<vmem>>, vector<1x8x32xf32>
    %84 = vector.shape_cast %83 : vector<1x8x32xf32> to vector<8x32xf32>
    %cst_43 = arith.constant dense<0.000000e+00> : vector<8x32xf32>
    %85 = tpu.matmul %82, %84, %cst_43 {dimension_numbers = #tpu.dot_dimension_numbers<[1], [0], [0], [1], [0, 0, 1, 1], [], []>} : vector<8x8xf32>, vector<8x32xf32>, vector<8x32xf32> -> vector<8x32xf32>
    %86 = arith.addf %65, %85 : vector<8x32xf32>
    %87 = vector.extract_strided_slice %10 {offsets = [0, 24], sizes = [8, 8], strides = [1, 1]} : vector<8x32xf32> to vector<8x8xf32>
    %88 = vector.extract_strided_slice %17 {offsets = [0, 24], sizes = [8, 8], strides = [1, 1]} : vector<8x32xf32> to vector<8x8xf32>
    %89 = vector.extract_strided_slice %24 {offsets = [0, 24], sizes = [8, 8], strides = [1, 1]} : vector<8x32xf32> to vector<8x8xf32>
    %cst_44 = arith.constant dense<0.000000e+00> : vector<8x8xf32>
    %90 = tpu.matmul %87, %88, %cst_44 {dimension_numbers = #tpu.dot_dimension_numbers<[1], [1], [0], [0], [0, 0, 1, 0], [], []>} : vector<8x8xf32>, vector<8x8xf32>, vector<8x8xf32> -> vector<8x8xf32>
    %cst_45 = arith.constant 0.353553385 : f32
    %91 = vector.broadcast %cst_45 : f32 to vector<8x8xf32>
    %92 = arith.mulf %90, %91 : vector<8x8xf32>
    %cst_46 = arith.constant dense<0xFF800000> : vector<8xf32>
    %93 = vector.multi_reduction <maximumf>, %92, %cst_46 [1] : vector<8x8xf32> to vector<8xf32>
    %94 = vector.shape_cast %93 : vector<8xf32> to vector<8x1xf32>
    %95 = vector.broadcast %94 : vector<8x1xf32> to vector<8x8xf32>
    %96 = arith.subf %92, %95 : vector<8x8xf32>
    %97 = math.exp %96 : vector<8x8xf32>
    %cst_47 = arith.constant dense<0.000000e+00> : vector<8xf32>
    %98 = vector.multi_reduction <add>, %97, %cst_47 [1] : vector<8x8xf32> to vector<8xf32>
    %99 = vector.shape_cast %98 : vector<8xf32> to vector<8x1xf32>
    %100 = tpu.reciprocal %99 {approx = true} : vector<8x1xf32> -> vector<8x1xf32>
    %101 = vector.broadcast %100 : vector<8x1xf32> to vector<8x8xf32>
    %102 = arith.mulf %97, %101 : vector<8x8xf32>
    %cst_48 = arith.constant dense<0.000000e+00> : vector<8x8xf32>
    %103 = tpu.matmul %102, %89, %cst_48 {dimension_numbers = #tpu.dot_dimension_numbers<[1], [0], [0], [1], [0, 0, 1, 1], [], []>} : vector<8x8xf32>, vector<8x8xf32>, vector<8x8xf32> -> vector<8x8xf32>
    %c3 = arith.constant 3 : index
    %c0_49 = arith.constant 0 : index
    %c0_50 = arith.constant 0 : index
    %104 = vector.load %arg10[%c3, %c0_49, %c0_50] : memref<4x8x32xf32, #tpu.memory_space<vmem>>, vector<1x8x32xf32>
    %105 = vector.shape_cast %104 : vector<1x8x32xf32> to vector<8x32xf32>
    %cst_51 = arith.constant dense<0.000000e+00> : vector<8x32xf32>
    %106 = tpu.matmul %103, %105, %cst_51 {dimension_numbers = #tpu.dot_dimension_numbers<[1], [0], [0], [1], [0, 0, 1, 1], [], []>} : vector<8x8xf32>, vector<8x32xf32>, vector<8x32xf32> -> vector<8x32xf32>
    %107 = arith.addf %86, %106 : vector<8x32xf32>
    %c0_52 = arith.constant 0 : index
    %c0_53 = arith.constant 0 : index
    %108 = vector.load %arg11[%c0_52, %c0_53] : memref<1x32xf32, #tpu.memory_space<vmem>>, vector<1x32xf32>
    %109 = vector.shape_cast %108 : vector<1x32xf32> to vector<32xf32>
    %110 = vector.shape_cast %109 : vector<32xf32> to vector<1x32xf32>
    %111 = vector.broadcast %110 : vector<1x32xf32> to vector<8x32xf32>
    %112 = arith.addf %107, %111 : vector<8x32xf32>
    %113 = arith.addf %1, %112 : vector<8x32xf32>
    %cst_54 = arith.constant dense<0.000000e+00> : vector<8xf32>
    %114 = vector.multi_reduction <add>, %113, %cst_54 [1] : vector<8x32xf32> to vector<8xf32>
    %115 = vector.shape_cast %114 : vector<8xf32> to vector<8x1xf32>
    %cst_55 = arith.constant 3.200000e+01 : f32
    %116 = vector.broadcast %cst_55 : f32 to vector<8x1xf32>
    %117 = arith.divf %115, %116 : vector<8x1xf32>
    %118 = vector.broadcast %117 : vector<8x1xf32> to vector<8x32xf32>
    %119 = arith.subf %113, %118 : vector<8x32xf32>
    %120 = arith.mulf %119, %119 : vector<8x32xf32>
    %cst_56 = arith.constant dense<0.000000e+00> : vector<8xf32>
    %121 = vector.multi_reduction <add>, %120, %cst_56 [1] : vector<8x32xf32> to vector<8xf32>
    %122 = vector.shape_cast %121 : vector<8xf32> to vector<8x1xf32>
    %cst_57 = arith.constant 3.200000e+01 : f32
    %123 = vector.broadcast %cst_57 : f32 to vector<8x1xf32>
    %124 = arith.divf %122, %123 : vector<8x1xf32>
    %125 = vector.broadcast %117 : vector<8x1xf32> to vector<8x32xf32>
    %126 = arith.subf %113, %125 : vector<8x32xf32>
    %cst_58 = arith.constant 9.99999974E-6 : f32
    %127 = vector.broadcast %cst_58 : f32 to vector<8x1xf32>
    %128 = arith.addf %124, %127 : vector<8x1xf32>
    %129 = math.rsqrt %128 : vector<8x1xf32>
    %130 = vector.broadcast %129 : vector<8x1xf32> to vector<8x32xf32>
    %131 = arith.mulf %126, %130 : vector<8x32xf32>
    %c0_59 = arith.constant 0 : index
    %c0_60 = arith.constant 0 : index
    %132 = vector.load %arg12[%c0_59, %c0_60] : memref<1x32xf32, #tpu.memory_space<vmem>>, vector<1x32xf32>
    %133 = vector.shape_cast %132 : vector<1x32xf32> to vector<32xf32>
    %134 = vector.shape_cast %133 : vector<32xf32> to vector<1x32xf32>
    %135 = vector.broadcast %134 : vector<1x32xf32> to vector<8x32xf32>
    %136 = arith.mulf %131, %135 : vector<8x32xf32>
    %c0_61 = arith.constant 0 : index
    %c0_62 = arith.constant 0 : index
    %137 = vector.load %arg13[%c0_61, %c0_62] : memref<1x32xf32, #tpu.memory_space<vmem>>, vector<1x32xf32>
    %138 = vector.shape_cast %137 : vector<1x32xf32> to vector<32xf32>
    %139 = vector.shape_cast %138 : vector<32xf32> to vector<1x32xf32>
    %140 = vector.broadcast %139 : vector<1x32xf32> to vector<8x32xf32>
    %141 = arith.addf %136, %140 : vector<8x32xf32>
    %c0_63 = arith.constant 0 : index
    %c0_64 = arith.constant 0 : index
    %142 = vector.load %arg14[%c0_63, %c0_64] : memref<32x128xf32, #tpu.memory_space<vmem>>, vector<32x128xf32>
    %cst_65 = arith.constant dense<0.000000e+00> : vector<8x128xf32>
    %143 = tpu.matmul %141, %142, %cst_65 {dimension_numbers = #tpu.dot_dimension_numbers<[1], [0], [0], [1], [0, 0, 1, 1], [], []>} : vector<8x32xf32>, vector<32x128xf32>, vector<8x128xf32> -> vector<8x128xf32>
    %c0_66 = arith.constant 0 : index
    %c0_67 = arith.constant 0 : index
    %144 = vector.load %arg15[%c0_66, %c0_67] : memref<1x128xf32, #tpu.memory_space<vmem>>, vector<1x128xf32>
    %145 = vector.shape_cast %144 : vector<1x128xf32> to vector<128xf32>
    %146 = vector.shape_cast %145 : vector<128xf32> to vector<1x128xf32>
    %147 = vector.broadcast %146 : vector<1x128xf32> to vector<8x128xf32>
    %148 = arith.addf %143, %147 : vector<8x128xf32>
    %cst_68 = arith.constant 0.000000e+00 : f32
    %149 = vector.broadcast %cst_68 : f32 to vector<8x128xf32>
    %150 = arith.maximumf %148, %149 : vector<8x128xf32>
    %c0_69 = arith.constant 0 : index
    %c0_70 = arith.constant 0 : index
    %151 = vector.load %arg16[%c0_69, %c0_70] : memref<128x32xf32, #tpu.memory_space<vmem>>, vector<128x32xf32>
    %cst_71 = arith.constant dense<0.000000e+00> : vector<8x32xf32>
    %152 = tpu.matmul %150, %151, %cst_71 {dimension_numbers = #tpu.dot_dimension_numbers<[1], [0], [0], [1], [0, 0, 1, 1], [], []>} : vector<8x128xf32>, vector<128x32xf32>, vector<8x32xf32> -> vector<8x32xf32>
    %c0_72 = arith.constant 0 : index
    %c0_73 = arith.constant 0 : index
    %153 = vector.load %arg17[%c0_72, %c0_73] : memref<1x32xf32, #tpu.memory_space<vmem>>, vector<1x32xf32>
    %154 = vector.shape_cast %153 : vector<1x32xf32> to vector<32xf32>
    %155 = vector.shape_cast %154 : vector<32xf32> to vector<1x32xf32>
    %156 = vector.broadcast %155 : vector<1x32xf32> to vector<8x32xf32>
    %157 = arith.addf %152, %156 : vector<8x32xf32>
    %158 = arith.addf %141, %157 : vector<8x32xf32>
    %cst_74 = arith.constant dense<0.000000e+00> : vector<8xf32>
    %159 = vector.multi_reduction <add>, %158, %cst_74 [1] : vector<8x32xf32> to vector<8xf32>
    %160 = vector.shape_cast %159 : vector<8xf32> to vector<8x1xf32>
    %cst_75 = arith.constant 3.200000e+01 : f32
    %161 = vector.broadcast %cst_75 : f32 to vector<8x1xf32>
    %162 = arith.divf %160, %161 : vector<8x1xf32>
    %163 = vector.broadcast %162 : vector<8x1xf32> to vector<8x32xf32>
    %164 = arith.subf %158, %163 : vector<8x32xf32>
    %165 = arith.mulf %164, %164 : vector<8x32xf32>
    %cst_76 = arith.constant dense<0.000000e+00> : vector<8xf32>
    %166 = vector.multi_reduction <add>, %165, %cst_76 [1] : vector<8x32xf32> to vector<8xf32>
    %167 = vector.shape_cast %166 : vector<8xf32> to vector<8x1xf32>
    %cst_77 = arith.constant 3.200000e+01 : f32
    %168 = vector.broadcast %cst_77 : f32 to vector<8x1xf32>
    %169 = arith.divf %167, %168 : vector<8x1xf32>
    %170 = vector.broadcast %162 : vector<8x1xf32> to vector<8x32xf32>
    %171 = arith.subf %158, %170 : vector<8x32xf32>
    %cst_78 = arith.constant 9.99999974E-6 : f32
    %172 = vector.broadcast %cst_78 : f32 to vector<8x1xf32>
    %173 = arith.addf %169, %172 : vector<8x1xf32>
    %174 = math.rsqrt %173 : vector<8x1xf32>
    %175 = vector.broadcast %174 : vector<8x1xf32> to vector<8x32xf32>
    %176 = arith.mulf %171, %175 : vector<8x32xf32>
    %c0_79 = arith.constant 0 : index
    %c0_80 = arith.constant 0 : index
    %177 = vector.load %arg18[%c0_79, %c0_80] : memref<1x32xf32, #tpu.memory_space<vmem>>, vector<1x32xf32>
    %178 = vector.shape_cast %177 : vector<1x32xf32> to vector<32xf32>
    %179 = vector.shape_cast %178 : vector<32xf32> to vector<1x32xf32>
    %180 = vector.broadcast %179 : vector<1x32xf32> to vector<8x32xf32>
    %181 = arith.mulf %176, %180 : vector<8x32xf32>
    %c0_81 = arith.constant 0 : index
    %c0_82 = arith.constant 0 : index
    %182 = vector.load %arg19[%c0_81, %c0_82] : memref<1x32xf32, #tpu.memory_space<vmem>>, vector<1x32xf32>
    %183 = vector.shape_cast %182 : vector<1x32xf32> to vector<32xf32>
    %184 = vector.shape_cast %183 : vector<32xf32> to vector<1x32xf32>
    %185 = vector.broadcast %184 : vector<1x32xf32> to vector<8x32xf32>
    %186 = arith.addf %181, %185 : vector<8x32xf32>
    %c0_83 = arith.constant 0 : index
    %c0_84 = arith.constant 0 : index
    %c0_85 = arith.constant 0 : index
    %187 = vector.load %arg20[%c0_83, %c0_84, %c0_85] : memref<1x8x32xf32, #tpu.memory_space<vmem>>, vector<1x8x32xf32>
    %188 = vector.shape_cast %187 : vector<1x8x32xf32> to vector<8x32xf32>
    %189 = vector.shape_cast %186 : vector<8x32xf32> to vector<1x8x32xf32>
    tpu.vector_store %arg20[%c0_83, %c0_84, %c0_85], %189 {strides = array<i32>} : memref<1x8x32xf32, #tpu.memory_space<vmem>>, vector<1x8x32xf32>,
    return
  }
  func.func @transform_0(%arg0: i32, %arg1: i32) -> (i32, i32, i32) {
    %c0_i32 = arith.constant 0 : i32
    %c0_i32_0 = arith.constant 0 : i32
    return %arg0, %arg1, %c0_i32 : i32, i32, i32
  }
  func.func @transform_1(%arg0: i32, %arg1: i32) -> (i32, i32, i32) {
    %c0_i32 = arith.constant 0 : i32
    %c0_i32_0 = arith.constant 0 : i32
    %c0_i32_1 = arith.constant 0 : i32
    return %arg0, %c0_i32, %c0_i32_0 : i32, i32, i32
  }
  func.func @transform_2(%arg0: i32, %arg1: i32) -> (i32, i32) {
    %c0_i32 = arith.constant 0 : i32
    %c0_i32_0 = arith.constant 0 : i32
    %c0_i32_1 = arith.constant 0 : i32
    return %c0_i32, %c0_i32_0 : i32, i32
  }
  func.func @transform_3(%arg0: i32, %arg1: i32) -> (i32, i32) {
    %c0_i32 = arith.constant 0 : i32
    %c0_i32_0 = arith.constant 0 : i32
    %c0_i32_1 = arith.constant 0 : i32
    return %c0_i32, %c0_i32_0 : i32, i32
  }
  func.func @transform_4(%arg0: i32, %arg1: i32) -> (i32, i32) {
    %c0_i32 = arith.constant 0 : i32
    %c0_i32_0 = arith.constant 0 : i32
    %c0_i32_1 = arith.constant 0 : i32
    return %c0_i32, %c0_i32_0 : i32, i32
  }
  func.func @transform_5(%arg0: i32, %arg1: i32) -> (i32, i32) {
    %c0_i32 = arith.constant 0 : i32
    %c0_i32_0 = arith.constant 0 : i32
    %c0_i32_1 = arith.constant 0 : i32
    return %c0_i32, %c0_i32_0 : i32, i32
  }
  func.func @transform_6(%arg0: i32, %arg1: i32) -> (i32, i32) {
    %c0_i32 = arith.constant 0 : i32
    %c0_i32_0 = arith.constant 0 : i32
    %c0_i32_1 = arith.constant 0 : i32
    return %c0_i32, %c0_i32_0 : i32, i32
  }
  func.func @transform_7(%arg0: i32, %arg1: i32) -> (i32, i32) {
    %c0_i32 = arith.constant 0 : i32
    %c0_i32_0 = arith.constant 0 : i32
    %c0_i32_1 = arith.constant 0 : i32
    return %c0_i32, %c0_i32_0 : i32, i32
  }
  func.func @transform_8(%arg0: i32, %arg1: i32) -> (i32, i32, i32) {
    %c0_i32 = arith.constant 0 : i32
    %c0_i32_0 = arith.constant 0 : i32
    %c0_i32_1 = arith.constant 0 : i32
    %c0_i32_2 = arith.constant 0 : i32
    return %c0_i32, %c0_i32_0, %c0_i32_1 : i32, i32, i32
  }
  func.func @transform_9(%arg0: i32, %arg1: i32) -> (i32, i32) {
    %c0_i32 = arith.constant 0 : i32
    %c0_i32_0 = arith.constant 0 : i32
    %c0_i32_1 = arith.constant 0 : i32
    return %c0_i32, %c0_i32_0 : i32, i32
  }
  func.func @transform_10(%arg0: i32, %arg1: i32) -> (i32, i32) {
    %c0_i32 = arith.constant 0 : i32
    %c0_i32_0 = arith.constant 0 : i32
    %c0_i32_1 = arith.constant 0 : i32
    return %c0_i32, %c0_i32_0 : i32, i32
  }
  func.func @transform_11(%arg0: i32, %arg1: i32) -> (i32, i32) {
    %c0_i32 = arith.constant 0 : i32
    %c0_i32_0 = arith.constant 0 : i32
    %c0_i32_1 = arith.constant 0 : i32
    return %c0_i32, %c0_i32_0 : i32, i32
  }
  func.func @transform_12(%arg0: i32, %arg1: i32) -> (i32, i32) {
    %c0_i32 = arith.constant 0 : i32
    %c0_i32_0 = arith.constant 0 : i32
    %c0_i32_1 = arith.constant 0 : i32
    return %c0_i32, %c0_i32_0 : i32, i32
  }
  func.func @transform_13(%arg0: i32, %arg1: i32) -> (i32, i32) {
    %c0_i32 = arith.constant 0 : i32
    %c0_i32_0 = arith.constant 0 : i32
    %c0_i32_1 = arith.constant 0 : i32
    return %c0_i32, %c0_i32_0 : i32, i32
  }
  func.func @transform_14(%arg0: i32, %arg1: i32) -> (i32, i32) {
    %c0_i32 = arith.constant 0 : i32
    %c0_i32_0 = arith.constant 0 : i32
    %c0_i32_1 = arith.constant 0 : i32
    return %c0_i32, %c0_i32_0 : i32, i32
  }
  func.func @transform_15(%arg0: i32, %arg1: i32) -> (i32, i32) {
    %c0_i32 = arith.constant 0 : i32
    %c0_i32_0 = arith.constant 0 : i32
    %c0_i32_1 = arith.constant 0 : i32
    return %c0_i32, %c0_i32_0 : i32, i32
  }
  func.func @transform_16(%arg0: i32, %arg1: i32) -> (i32, i32) {
    %c0_i32 = arith.constant 0 : i32
    %c0_i32_0 = arith.constant 0 : i32
    %c0_i32_1 = arith.constant 0 : i32
    return %c0_i32, %c0_i32_0 : i32, i32
  }
  func.func @transform_17(%arg0: i32, %arg1: i32) -> (i32, i32) {
    %c0_i32 = arith.constant 0 : i32
    %c0_i32_0 = arith.constant 0 : i32
    %c0_i32_1 = arith.constant 0 : i32
    return %c0_i32, %c0_i32_0 : i32, i32
  }
  func.func @transform_18(%arg0: i32, %arg1: i32) -> (i32, i32, i32) {
    %c0_i32 = arith.constant 0 : i32
    %c0_i32_0 = arith.constant 0 : i32
    return %arg0, %arg1, %c0_i32 : i32, i32, i32
  }
}

</mosaic_0001>

<bundles_post_ra>
// kernel: tpu_custom_call.1
= control target key start
LH: loop header
LB: loop body
LE: loop exit
PB: predicated region body
PF: predicated region fallthrough
CT: control target
= control target key end

     0   :  { %s3256_s0 = inlined_call_operand.hbm [shape: f32[2,8,32], index: 0, kind: input, shape index: {}]   ;;  %s3257_s1 = inlined_call_operand.hbm [shape: f32[2,8,32], index: 1, kind: input, shape index: {}]   ;;  %s3258_s2 = inlined_call_operand.vmem [shape: f32[32,32], index: 2, kind: input, shape index: {}]   ;;  %s3259_s3 = inlined_call_operand.vmem [shape: f32[32,32], index: 3, kind: input, shape index: {}]   ;;  %s3260_s4 = inlined_call_operand.vmem [shape: f32[32,32], index: 4, kind: input, shape index: {}]   ;;  %s3261_s5 = inlined_call_operand.vmem [shape: f32[1,32], index: 5, kind: input, shape index: {}]   ;;  %s3262_s6 = inlined_call_operand.vmem [shape: f32[1,32], index: 6, kind: input, shape index: {}]   ;;  %s3263_s7 = inlined_call_operand.vmem [shape: f32[1,32], index: 7, kind: input, shape index: {}]   ;;  %s3264_s8 = inlined_call_operand.vmem [shape: f32[4,8,32], index: 8, kind: input, shape index: {}]   ;;  %s3265_s9 = inlined_call_operand.vmem [shape: f32[1,32], index: 9, kind: input, shape index: {}]   ;;  %s3266_s10 = inlined_call_operand.vmem [shape: f32[1,32], index: 10, kind: input, shape index: {}]   ;;  %s3267_s11 = inlined_call_operand.vmem [shape: f32[1,32], index: 11, kind: input, shape index: {}]   ;;  %s3268_s12 = inlined_call_operand.vmem [shape: f32[32,128], index: 12, kind: input, shape index: {}]   ;;  %s3269_s13 = inlined_call_operand.vmem [shape: f32[1,128], index: 13, kind: input, shape index: {}]   ;;  %s3270_s14 = inlined_call_operand.vmem [shape: f32[128,32], index: 14, kind: input, shape index: {}]   ;;  %s3271_s15 = inlined_call_operand.vmem [shape: f32[1,32], index: 15, kind: input, shape index: {}]   ;;  %s3272_s16 = inlined_call_operand.vmem [shape: f32[1,32], index: 16, kind: input, shape index: {}]   ;;  %s3273_s17 = inlined_call_operand.vmem [shape: f32[1,32], index: 17, kind: input, shape index: {}]   ;;  %s3274_s18 = inlined_call_operand.hbm [shape: f32[2,8,32], index: 18, kind: output, shape index: {}]  }
   0x1   :  { %3284 = sst [smem:[#allocation19_spill]] %s3256_s0 }
   0x2   :  { %3285 = sst [smem:[#allocation20_spill]] %s3257_s1 }
   0x3   :  { %3286 = sst [smem:[#allocation21_spill]] %s3258_s2 }
   0x4   :  { %3287 = sst [smem:[#allocation22_spill]] %s3259_s3 }
   0x5   :  { %3288 = sst [smem:[#allocation23_spill]] %s3260_s4 }
   0x6   :  { %3289 = sst [smem:[#allocation24_spill]] %s3261_s5 }
   0x7   :  { %3290 = sst [smem:[#allocation25_spill]] %s3271_s15 }
   0x8   :  { %3291 = sst [smem:[#allocation26_spill]] %s3272_s16 }
   0x9   :  { %3292 = sst [smem:[#allocation27_spill]] %s3273_s17 }
   0xa   :  { %3293 = sst [smem:[#allocation28_spill]] %s3274_s18 }
   0xb   :  { %23 = vsyncpa [#allocation3], 0 }
   0xc   :  { %25 = vsyncpa [#allocation3 + $0x1], 0 }
   0xd   :  { %26 = vsyncpa [#allocation6], 0 }
   0xe   :  { %28 = vsyncpa [#allocation6 + $0x1], 0 }
   0xf   :  { %29 = vsyncpa [#allocation4], 0 }
  0x10   :  { %31 = vsyncpa [#allocation4 + $0x1], 0  ;;  %s2811_s27 = smov 0   ;;  %s2813_s28 = smov 0  }
  0x11   :  { %s2815_s29 = smov 0   ;;  %s2817_s30 = smov 0  }
  0x12   :  { %s2819_s0 = smov 0   ;;  %s2821_s19 = smov 0  }
  0x13 LB: > { %3294 = sst [smem:[#allocation11_spill]] %s2686_s27  ;;  %s2225_s1 = sadd.s32 4294967295, %s2706_s19   ;;  %s2706_s19 = sphi %s2821_s19, %s37_s19   ;;  %s2702_s0 = sphi %s2819_s0, %s3327_s0   ;;  %s2698_s30 = sphi %s2817_s30, %s3326_s30   ;;  %s2694_s29 = sphi %s2815_s29, %s3325_s29   ;;  %s2690_s28 = sphi %s2813_s28, %s3329_s28   ;;  %s2686_s27 = sphi %s2811_s27, %s3328_s27  }
  0x14   : > { %3295 = sst [smem:[#allocation12_spill]] %s2694_s29  ;;  %s2226_s20 = sadd.s32 4294967294, %s2706_s19  }
  0x15   : > { %3296 = sst [smem:[#allocation13_spill]] %s2698_s30  ;;  %s49_s21 = sadd.s32 1, %s2702_s0 }
  0x16   : > { %3297 = sst [smem:[#allocation14_spill]] %s2702_s0  ;;  %s58_s22 = sadd.s32 1, %s2694_s29 }
  0x17   : > { %p51_p0 = scmp.ge.s32.totalorder %s49_s21, 2  ;;  %p65_p1 = scmp.ne.s32.totalorder %s2694_s29, %s2690_s28 }
  0x18   : > { %p66_p2 = scmp.eq.s32.totalorder %s2706_s19, 0  ;;  %p71_p3 = scmp.ne.s32.totalorder %s2690_s28, %s2686_s27 }
  0x19   : > { %s3331_s21 = smov (%p51_p0, %s49_s21), 0  ;;  %p72_p5 = scmp.eq.s32.totalorder %s2225_s1, 0 }
  0x1a   : > { %3298 = sst [smem:[#allocation15_spill]] %s3331_s21  ;;  %p2852_p4 = por %p66_p2, %p65_p1 }
  0x1b   : > { %s53_s23 = ssub.s32 %s2702_s0, %s3331_s21  ;;  %p459_p6 = scmp.eq.s32.totalorder %s2225_s1, 1 }
  0x1c   : > { %p56_p7 = scmp.eq.s32.totalorder %s53_s23, 0  ;;  %p2858_p8 = por %p72_p5, %p71_p3 }
  0x1d   : > { %p2862_p9 = por %p459_p6, %p65_p1  ;;  %p465_p10 = scmp.eq.s32.totalorder %s2226_s20, 1 }
  0x1e   : > { %s2867_s26 = scalar_select %p56_p7, %s2694_s29, %s58_s22  }
  0x1f   : > { %s3301_s25 = scalar_select %p2862_p9, 1, 0 }
  0x20   : > { %3303 = sst [smem:[#allocation17_spill]] %s2867_s26  ;;  %p2869_p11 = por %p465_p10, %p71_p3 }
  0x21   : > { %3302 = sst [smem:[#allocation16_spill]] %s3301_s25  ;;  %p2491_p13 = scmp.lt.s32.totalorder %s2706_s19, 2 }
  0x22   : > { %s3304_s27 = scalar_select %p2869_p11, 1, 0 }
  0x23   : > { %s2876_s1 = sand.u32 1, %s2694_s29   ;;  %s2230_s21 = sshll.u32 %s2702_s0, 7 }
  0x24   : > { %3305 = sst [smem:[#allocation18_spill]] %s3304_s27  ;;  %s2229_s23 = sshll.u32 %s2876_s1, 3 }
  0x25   : > { %s3306_s16 = sld [smem:[#allocation19_spill]]  ;;  %s537_s25 = scalar_lea.vmem [#allocation2], %s2229_s23 }
  0x26   : > { %s545_s20 = sshll.u32 %s537_s25, 4  ;;  %p2885_p0 = pnand %p2491_p13, %p2852_p4  ;;  %s546_s20 = int_to_ptr.vmem [resolvable:$true] %s545_s20 }
  0x27   : > { %p2233_p1 = scmp.ge.s32.totalorder %s2706_s19, 1  ;;  %p568_p2 = scmp.lt.s32.totalorder %s2706_s19, 3 }
  0x28   : > { %s534_s26 = scalar_lea.sflag [#allocation3], %s2876_s1  ;;  %p2568_p3 = pneg %p2885_p0 }
  0x29   : > { %s2579_s0 = scalar_lea.vmem %s546_s20, 128 }
  0x2a   : > { %p2580_p5 = scmp.ne.s32.totalorder %s546_s20, %s2579_s0 }
  0x2b   : > { %s543_s30 = scalar_lea.hbm %s3306_s16, %s2230_s21  ;;  %s2708_s16 = smov [#allocation2]  }
  0x2c   : > { %p2582_p6 = pnand %p2580_p5, %p2568_p3  ;;  %s2584_s17 = sshll.u32 %s2708_s16, 4  ;;  %s2585_s17 = int_to_ptr.vmem [resolvable:$false] %s2584_s17 }
  0x2d   : > { %s2586_s18 = scalar_lea.vmem %s2585_s17, 256  ;;  %p2587_p4 = scmp.lt.s32.totalorder %s546_s20, %s2585_s17 }
  0x2e   : > { %p2583_p7 = pneg %p2582_p6  ;;  %p2588_p10 = scmp.lt.s32.totalorder %s2586_s18, %s2579_s0 }
  0x30   : > { %p2589_p13 = por %p2588_p10, %p2587_p4 }
  0x32   : > { %p2590_p12 = pnand %p2589_p13, %p2583_p7 }
  0x34   : > { %2593 = shalt.err (!%p2590_p12)
}
  0x35   : > { %2483 = dma.hbm_to_vmem [thread:$0]  (!%p2885_p0), %s543_s30, 128, %s546_s20, %s534_s26  }
  0x36   : > { %p2903_p5 = pnand %p2233_p1, %p568_p2  ;;  %s3309_s17 = sld [smem:[#allocation20_spill]] }
  0x37   : > { %s556_s18 = scalar_lea.vmem [#allocation5], %s2229_s23  ;;  %s553_s27 = scalar_lea.sflag [#allocation6], %s2876_s1 }
  0x38   : > { %s563_s29 = sshll.u32 %s556_s18, 4  ;;  %s2709_s30 = smov [#allocation5]   ;;  %s564_s29 = int_to_ptr.vmem [resolvable:$true] %s563_s29 }
  0x39   : > { %s2607_s15 = scalar_lea.vmem %s564_s29, 128  ;;  %s2612_s26 = sshll.u32 %s2709_s30, 4  ;;  %s2613_s26 = int_to_ptr.vmem [resolvable:$false] %s2612_s26 }
  0x3a   : > { %p2608_p12 = scmp.ne.s32.totalorder %s564_s29, %s2607_s15  ;;  %s2614_s20 = scalar_lea.vmem %s2613_s26, 256 }
  0x3b   : > { %p2615_p1 = scmp.lt.s32.totalorder %s564_s29, %s2613_s26  ;;  %p2616_p2 = scmp.lt.s32.totalorder %s2614_s20, %s2607_s15 }
  0x3c   : > { %s561_s0 = scalar_lea.hbm %s3309_s17, %s2230_s21  ;;  %p2610_p6 = pnand %p2608_p12, %p2568_p3 }
  0x3d   : > { %p2617_p4 = por %p2616_p2, %p2615_p1 }
  0x3e   : > { %p2611_p7 = pneg %p2610_p6 }
  0x40   : > { %p2618_p10 = pnand %p2617_p4, %p2611_p7 }
  0x42   : > { %2621 = shalt.err (!%p2618_p10)
}
  0x43   : > { %2486 = dma.hbm_to_vmem [thread:$0]  (!%p2885_p0), %s561_s0, 128, %s564_s29, %s553_s27  }
  0x44   : > { %572 = sbr.rel (%p2903_p5) target bundleno = 3549 (0xddd), region = 92  ;;  %s2919_s21 = sand.u32 (!%p2903_p5), 1, %s2690_s28  }
  0x45   : > { %s2922_s1 = sshll.u32 (!%p2903_p5), %s2919_s21, 3  ;;  %s575_s23 = scalar_lea.sflag (!%p2903_p5), [#allocation3], %s2919_s21 }
  0x46   : > { %s578_s15 = scalar_lea.vmem (!%p2903_p5), [#allocation2], %s2922_s1 }
  0x49   : > { %2673 = dma.done.wait (%p2858_p8), %s575_s23, 128  }
  0x4a   : > { %2675 = vsyncadd (%p2858_p8), %s575_s23, 4294967168  ;;  %s584_s27 = scalar_lea.sflag [#allocation6], %s2919_s21  ;;  %s587_s29 = scalar_lea.vmem [#allocation5], %s2922_s1 }
  0x4b   : > { %2677 = dma.done.wait (%p2858_p8), %s584_s27, 128  }
  0x4c   : > { %2679 = vsyncadd (%p2858_p8), %s584_s27, 4294967168  ;;  %v2710_v0 = vmov 0.0   ;;  %vm2711_vm0 = vmmov 0   ;;  %s3310_s25 = sld [smem:[#allocation21_spill]]  ;;  %v2956_v5 = vld [vmem:[%s578_s15] sm:$0xff]  ;;  %vm658_vm1 = vcmask 261120  }
  0x4d   : > { %2335 = vmatprep.subr.mxu0 %v2710_v0  ;;  %2343 = vmatprep.mubr.msk.f32.mxu0 %vm2711_vm0, %v2710_v0  ;;  %s3311_s3 = sld [smem:[#allocation22_spill]]  ;;  %v646_v10 = vld [vmem:[%s587_s29] sm:$0xff]  ;;  %v2239_v17 = vld [vmem:[%s3262_s6] ss:$0 sm:$0xff]  ;;  %vm897_vm2 = vcmask 64512   ;;  %s2712_s2 = smov 120  }
  0x4e   : > { %2373 = vmatprep.subr.mxu1 %v2710_v0  ;;  %2375 = vmatprep.mubr.msk.f32.mxu1 %vm2711_vm0, %v2710_v0  ;;  %s3312_s4 = sld [smem:[#allocation23_spill]]  ;;  %v2241_v23 = vld [vmem:[%s3263_s7] ss:$0 sm:$0xff]  ;;  %s2713_s24 = smov 112   ;;  %v2249_v50 = vld [vmem:[%s3264_s8 + $0x8] sm:$0xff] }
  0x4f   : > { %s3313_s5 = sld [smem:[#allocation24_spill]]  ;;  %v1059_v55 = vld [vmem:[%s3264_s8] sm:$0xff]  ;;  %s2714_s26 = smov 104  }
  0x50   : > { %s3314_s30 = sld [smem:[#allocation25_spill]]  ;;  %s2715_s27 = smov [#allocation7]  }
  0x51   : > { %s3317_s15 = sld [smem:[#allocation26_spill]] }
  0x52   : > { %v650_v1 = vld [vmem:[%s3310_s25 + $0x18] sm:$0xff]  ;;  %v649_v2 = vld [vmem:[%s3310_s25 + $0x10] sm:$0xff]  ;;  %v648_v3 = vld [vmem:[%s3310_s25 + $0x8] sm:$0xff]  ;;  %s3318_s16 = sld [smem:[#allocation27_spill]] }
  0x53   : > { %2336 = vmatpush3.msra.mxu0 %v650_v1  ;;  %v647_v4 = vld [vmem:[%s3310_s25] sm:$0xff]  ;;  %v735_v6 = vld [vmem:[%s3311_s3 + $0x18] sm:$0xff]  ;;  %v734_v7 = vld [vmem:[%s3311_s3 + $0x10] sm:$0xff] }
  0x54   : > { %2337 = vmatprep.subr.mxu0 %v2710_v0  ;;  %v733_v8 = vld [vmem:[%s3311_s3 + $0x8] sm:$0xff]  ;;  %v732_v9 = vld [vmem:[%s3311_s3] sm:$0xff]  ;;  %v819_v11 = vld [vmem:[%s3312_s4 + $0x18] sm:$0xff] }
  0x55   : > { %2338 = vmatpush3.msra.mxu0 %v649_v2  ;;  %v818_v12 = vld [vmem:[%s3312_s4 + $0x10] sm:$0xff]  ;;  %v817_v13 = vld [vmem:[%s3312_s4 + $0x8] sm:$0xff]  ;;  %v816_v14 = vld [vmem:[%s3312_s4] sm:$0xff] }
  0x56   : > { %2339 = vmatprep.subr.mxu0 %v2710_v0  ;;  %v2237_v19 = vld [vmem:[%s3313_s5] ss:$0 sm:$0xff]  ;;  %s2108_s5 = scalar_lea.sflag [#allocation4], %s2919_s21 }
  0x57   : > { %2340 = vmatpush3.msra.mxu0 %v648_v3 }
  0x58   : > { %2341 = vmatprep.subr.mxu0 %v2710_v0 }
  0x59   : > { %2342 = vmatpush3.msra.mxu0 %v647_v4 }
  0x5a   : > { %2344 = vmatmul.mubr.msk.f32.vlgmr.msra.gmra.mxu0 %vm658_vm1, %v2956_v5  ;;  %2346 = vmatprep.subr.mxu0 %v2710_v0 }
  0x5b   : > { %2347 = vmatpush3.msra.mxu0 %v735_v6  ;;  %2354 = vmatprep.mubr.msk.f32.mxu0 %vm2711_vm0, %v2710_v0 }
  0x5c   : > { %2348 = vmatprep.subr.mxu0 %v2710_v0 }
  0x5d   : > { %2349 = vmatpush3.msra.mxu0 %v734_v7 }
  0x5e   : > { %2350 = vmatprep.subr.mxu0 %v2710_v0 }
  0x5f   : > { %2351 = vmatpush3.msra.mxu0 %v733_v8 }
  0x60   : > { %2352 = vmatprep.subr.mxu0 %v2710_v0 }
  0x61   : > { %2353 = vmatpush3.msra.mxu0 %v732_v9 }
  0x62   : > { %2355 = vmatmul.mubr.msk.f32.vlgmr.msra.gmra.mxu0 %vm658_vm1, %v646_v10  ;;  %2357 = vmatprep.subr.mxu0 %v2710_v0 }
  0x63   : > { %2365 = vmatprep.mubr.msk.f32.mxu0 %vm2711_vm0, %v2710_v0  ;;  %2358 = vmatpush3.msra.mxu0 %v819_v11 }
  0x64   : > { %2359 = vmatprep.subr.mxu0 %v2710_v0 }
  0x65   : > { %2360 = vmatpush3.msra.mxu0 %v818_v12 }
  0x66   : > { %2361 = vmatprep.subr.mxu0 %v2710_v0 }
  0x67   : > { %2362 = vmatpush3.msra.mxu0 %v817_v13 }
  0x68   : > { %2363 = vmatprep.subr.mxu0 %v2710_v0 }
  0x69   : > { %2364 = vmatpush3.msra.mxu0 %v816_v14 }
  0x6a   : > { %2366 = vmatmul.mubr.msk.f32.vlgmr.msra.gmra.mxu0 %vm658_vm1, %v646_v10  ;;  %2368 = vmatprep.subr.mxu0 %v2710_v0 }
  0x6b   : > { %2370 = vmatprep.mubr.msk.f32.mxu0 %vm2711_vm0, %v2710_v0 }
 0x11a   : > { %v728_v15 = vpop.f32.mrf.mxu0 }
 0x11b   : > { %v3016_v22 = vadd.f32 %v2237_v19, %v728_v15  ;;  %v2255_v19 = vld [vmem:[%s3264_s8 + $0x10] sm:$0xff] }
 0x11c   : > { %v2345_v16 = vpop.f32.mrf.mxu0 }
 0x122   : > { %v812_v18 = vpop.f32.mrf.mxu0 }
 0x123   : > { %v3010_v20 = vadd.f32 %v2239_v17, %v812_v18 }
 0x124   : > { %v2356_v21 = vpop.f32.mrf.mxu0 }
 0x125   : > { %1062 = vrot.lane.b32.xlu0 %v3010_v20, %s2712_s2  ;;  %2369 = vmatpush3.xpose.msk.msra.mxu0 %vm897_vm2, %v3010_v20 }
 0x126   : > { %2378 = vmatprep.subr.mxu0 %v2710_v0 }
 0x128   : > { %2371 = vmatmul.mubr.msk.f32.vlgmr.msra.gmra.mxu0 %vm897_vm2, %v3016_v22 }
 0x129   : > { %1060 = vrot.lane.b32.xlu0 %v3016_v22, %s2712_s2  ;;  %2380 = vmatprep.mubr.msk.f32.mxu0 %vm2711_vm0, %v2710_v0 }
 0x12a   : > { %v893_v24 = vpop.f32.mrf.mxu0 }
 0x12b   : > { %v3028_v25 = vadd.f32 %v2241_v23, %v893_v24 }
 0x12c   : > { %v2367_v26 = vpop.f32.mrf.mxu0 }
 0x12d   : > { %2374 = vmatpush3.msra.mxu1 %v3028_v25 }
 0x12e   : > { %2383 = vmatprep.subr.mxu1 %v2710_v0 }
 0x197   : > { %v1063_v27 = vpop.permute.xlu0 %1062 }
 0x198   : > { %2379 = vmatpush3.xpose.msk.msra.mxu0 %vm897_vm2, %v1063_v27 }
 0x199   : > { %2388 = vmatprep.subr.mxu0 %v2710_v0 }
 0x19b   : > { %v1061_v28 = vpop.permute.xlu0 %1060 }
 0x19c   : > { %2381 = vmatmul.mubr.msk.f32.vlgmr.msra.gmra.mxu0 %vm897_vm2, %v1061_v28 }
 0x19d   : > { %2390 = vmatprep.mubr.msk.f32.mxu0 %vm2711_vm0, %v2710_v0  ;;  %2389 = vmatpush3.msra.mxu0 %v2249_v50 }
 0x19e   : > { %2398 = vmatprep.subr.mxu0 %v2710_v0 }
 0x1e8   : > { %v970_v29 = vpop.f32.mrf.mxu0 }
 0x1e9   : > { %v974_v30 = vmul.f32 0.35355338, %v970_v29 }
 0x1ea   : > { %v2372_v31 = vpop.f32.mrf.mxu0 }
 0x1eb   : > { %v975_v32 = vsel %vm897_vm2, %v974_v30, -inf }
 0x1ec   : > { %976 = vmax.xlane.f32.xlu1 %v975_v32  ;;  %v2260_v32 = vld [vmem:[%s3264_s8 + $0x18] sm:$0xff] }
 0x25c   : > { %v1134_v33 = vpop.f32.mrf.mxu0 }
 0x25d   : > { %v1138_v34 = vmul.f32 0.35355338, %v1134_v33 }
 0x25e   : > { %v2382_v35 = vpop.f32.mrf.mxu0 }
 0x25f   : > { %v1139_v36 = vsel %vm897_vm2, %v1138_v34, -inf }
 0x260   : > { %1140 = vmax.xlane.f32.xlu1 %v1139_v36 }
 0x275   : > { %v977_v37 = vpop.xlane.xlu1 %976 }
 0x276   : > { %v978_v38 = vsub.f32 %v974_v30, %v977_v37 }
 0x278   : > { %v979_v39 = vmul.f32 1.442695, %v978_v38 }
 0x27a   : > { %2546 = vpow2.f32 %v979_v39 }
 0x287   : > { %v2547_v40 = vpop.eup %2546 }
 0x288   : > { %v981_v41 = vsel %vm897_vm2, %v2547_v40, 0.0 }
 0x289   : > { %982 = vadd.xlane.f32.xlu0 %v981_v41 }
 0x29f   : > { %1465 = vrot.lane.b32.xlu0 %v3028_v25, %s2713_s24 }
 0x2e9   : > { %v1141_v42 = vpop.xlane.xlu1 %1140 }
 0x2ea   : > { %v1142_v43 = vsub.f32 %v1138_v34, %v1141_v42 }
 0x2ec   : > { %v1143_v44 = vmul.f32 1.442695, %v1142_v43  ;;  %v2262_v43 = vld [vmem:[%s3265_s9] ss:$0 sm:$0xff] }
 0x2ee   : > { %2548 = vpow2.f32 %v1143_v44 }
 0x2fb   : > { %v2549_v45 = vpop.eup %2548 }
 0x2fc   : > { %v1145_v46 = vsel %vm897_vm2, %v2549_v45, 0.0 }
 0x2fd   : > { %1146 = vadd.xlane.f32.xlu1 %v1145_v46 }
 0x30e   : > { %1151 = vrot.lane.b32.xlu1 %v3028_v25, %s2712_s2 }
 0x312   : > { %v983_v47 = vpop.xlane.xlu0 %982  ;;  %1377 = vrot.lane.b32.xlu1 %v3010_v20, %s2713_s24 }
 0x313   : > { %2550 = vrcp.f32 %v983_v47 }
 0x316   : > { %1375 = vrot.lane.b32.xlu1 %v3016_v22, %s2713_s24  ;;  %v1466_v57 = vpop.permute.xlu0 %1465  ;;  %s644_s24 = scalar_lea.vmem [#allocation7], %s2922_s1 }
 0x317   : > { %s2122_s0 = sshll.u32 %s644_s24, 4  ;;  %s2123_s0 = int_to_ptr.vmem [resolvable:$true] %s2122_s0 }
 0x318   : > { %s2622_s23 = scalar_lea.vmem %s2123_s0, 128 }
 0x319   : > { %p2623_p8 = scmp.ne.s32.totalorder %s2123_s0, %s2622_s23 }
 0x31b   : > { %p2624_p0 = pnand %p2623_p8, %p2862_p9 }
 0x31d   : > { %p2625_p3 = pneg %p2624_p0 }
 0x320   : > { %v2551_v48 = vpop.eup %2550 }
 0x321   : > { %v985_v49 = vmul.f32 %v2551_v48, %v2547_v40 }
 0x323   : > { %2376 = vmatmul.mubr.msk.f32.vlgmr.msra.gmra.mxu1 %vm897_vm2, %v985_v49 }
 0x324   : > { %2385 = vmatprep.mubr.msk.f32.mxu1 %vm2711_vm0, %v2710_v0 }
 0x386   : > { %v1147_v51 = vpop.xlane.xlu1 %1146 }
 0x387   : > { %2552 = vrcp.f32 %v1147_v51 }
 0x38a   : > { %v1152_v52 = vpop.permute.xlu1 %1151 }
 0x38b   : > { %2384 = vmatpush3.msra.mxu1 %v1152_v52 }
 0x38c   : > { %2393 = vmatprep.subr.mxu1 %v2710_v0 }
 0x38e   : > { %v1378_v59 = vpop.permute.xlu1 %1377 }
 0x392   : > { %v1376_v62 = vpop.permute.xlu1 %1375 }
 0x394   : > { %v2553_v53 = vpop.eup %2552 }
 0x395   : > { %v1149_v54 = vmul.f32 %v2553_v53, %v2549_v45 }
 0x397   : > { %2386 = vmatmul.mubr.msk.f32.vlgmr.msra.gmra.mxu1 %vm897_vm2, %v1149_v54  ;;  %v1901_v54 = vld [vmem:[%s3268_s12 + $0x18] sm:$0xff] }
 0x398   : > { %2394 = vmatpush3.msra.mxu1 %v1059_v55  ;;  %2395 = vmatprep.mubr.msk.f32.mxu1 %vm2711_vm0, %v2710_v0  ;;  %v1900_v55 = vld [vmem:[%s3268_s12 + $0x10] sm:$0xff] }
 0x399   : > { %2403 = vmatprep.subr.mxu1 %v2710_v0 }
 0x3e3   : > { %v1055_v56 = vpop.f32.mrf.mxu1 }
 0x3e4   : > { %2396 = vmatmul.mubr.msk.f32.vlgmr.msra.gmra.mxu1 %vm897_vm2, %v1055_v56  ;;  %v1898_v56 = vld [vmem:[%s3268_s12] sm:$0xff] }
 0x3e5   : > { %2404 = vmatpush3.msra.mxu1 %v1466_v57  ;;  %v2377_v58 = vpop.f32.mrf.mxu1  ;;  %2405 = vmatprep.mubr.msk.f32.mxu1 %vm2711_vm0, %v2710_v0  ;;  %v1998_v57 = vld [vmem:[%s3270_s14 + $0x78] sm:$0xff] }
 0x3e6   : > { %2413 = vmatprep.subr.mxu1 %v2710_v0  ;;  %v1997_v58 = vld [vmem:[%s3270_s14 + $0x70] sm:$0xff] }
 0x457   : > { %v1223_v60 = vpop.f32.mrf.mxu1 }
 0x458   : > { %2391 = vmatmul.mubr.msk.f32.vlgmr.msra.gmra.mxu0 %vm897_vm2, %v1223_v60  ;;  %v1995_v60 = vld [vmem:[%s3270_s14 + $0x60] sm:$0xff] }
 0x459   : > { %2399 = vmatpush3.xpose.msk.msra.mxu0 %vm897_vm2, %v1378_v59  ;;  %v2387_v61 = vpop.f32.mrf.mxu1  ;;  %2400 = vmatprep.mubr.msk.f32.mxu0 %vm2711_vm0, %v2710_v0  ;;  %v1996_v59 = vld [vmem:[%s3270_s14 + $0x68] sm:$0xff] }
 0x45a   : > { %2408 = vmatprep.subr.mxu0 %v2710_v0  ;;  %v1994_v61 = vld [vmem:[%s3270_s14 + $0x58] sm:$0xff] }
 0x45c   : > { %2401 = vmatmul.mubr.msk.f32.vlgmr.msra.gmra.mxu0 %vm897_vm2, %v1376_v62  ;;  %v1993_v62 = vld [vmem:[%s3270_s14 + $0x50] sm:$0xff] }
 0x45d   : > { %2410 = vmatprep.mubr.msk.f32.mxu0 %vm2711_vm0, %v2710_v0  ;;  %2409 = vmatpush3.msra.mxu0 %v2255_v19  ;;  %v1983_v19 = vld [vmem:[%s3270_s14] sm:$0xff] }
 0x45e   : > { %2418 = vmatprep.subr.mxu0 %v2710_v0 }
 0x4a4   : > { %v1371_v63 = vpop.f32.mrf.mxu1 }
 0x4a6   : > { %v2397_v1 = vpop.f32.mrf.mxu1 }
 0x4a7   : > { %v1991_v1 = vld [vmem:[%s3270_s14 + $0x40] sm:$0xff] }
 0x518   : > { %v1298_v2 = vpop.f32.mrf.mxu0 }
 0x519   : > { %v1372_v33 = vadd.f32 %v1371_v63, %v1298_v2  ;;  %v1992_v63 = vld [vmem:[%s3270_s14 + $0x48] sm:$0xff]  ;;  %v1990_v2 = vld [vmem:[%s3270_s14 + $0x38] sm:$0xff] }
 0x51a   : > { %v2392_v3 = vpop.f32.mrf.mxu0 }
 0x51b   : > { %v1989_v3 = vld [vmem:[%s3270_s14 + $0x30] sm:$0xff] }
 0x51c   : > { %v1449_v4 = vpop.f32.mrf.mxu0 }
 0x51d   : > { %v1453_v6 = vmul.f32 0.35355338, %v1449_v4  ;;  %v1988_v4 = vld [vmem:[%s3270_s14 + $0x28] sm:$0xff] }
 0x51e   : > { %v2402_v7 = vpop.f32.mrf.mxu0 }
 0x51f   : > { %v1454_v8 = vsel %vm897_vm2, %v1453_v6, -inf  ;;  %v1986_v7 = vld [vmem:[%s3270_s14 + $0x18] sm:$0xff] }
 0x520   : > { %1455 = vmax.xlane.f32.xlu1 %v1454_v8 }
 0x5a9   : > { %v1456_v9 = vpop.xlane.xlu1 %1455 }
 0x5aa   : > { %v1457_v10 = vsub.f32 %v1453_v6, %v1456_v9  ;;  %v1987_v6 = vld [vmem:[%s3270_s14 + $0x20] sm:$0xff] }
 0x5ac   : > { %v1458_v11 = vmul.f32 1.442695, %v1457_v10 }
 0x5ae   : > { %2554 = vpow2.f32 %v1458_v11 }
 0x5bb   : > { %v2555_v12 = vpop.eup %2554 }
 0x5bc   : > { %v1460_v13 = vsel %vm897_vm2, %v2555_v12, 0.0 }
 0x5bd   : > { %1461 = vadd.xlane.f32.xlu0 %v1460_v13 }
 0x5d3   : > { %1619 = vrot.lane.b32.xlu0 %v3010_v20, %s2714_s26 }
 0x5d7   : > { %1617 = vrot.lane.b32.xlu0 %v3016_v22, %s2714_s26 }
 0x646   : > { %v1462_v14 = vpop.xlane.xlu0 %1461 }
 0x647   : > { %2556 = vrcp.f32 %v1462_v14  ;;  %v2264_v14 = vld [vmem:[%s3267_s11] ss:$0 sm:$0xff] }
 0x64a   : > { %v1620_v16 = vpop.permute.xlu0 %1619 }
 0x64e   : > { %v1618_v18 = vpop.permute.xlu0 %1617 }
 0x654   : > { %v2557_v15 = vpop.eup %2556 }
 0x655   : > { %v1464_v17 = vmul.f32 %v2557_v15, %v2555_v12  ;;  %v2263_v12 = vld [vmem:[%s3266_s10] ss:$0 sm:$0xff] }
 0x657   : > { %2406 = vmatmul.mubr.msk.f32.vlgmr.msra.gmra.mxu1 %vm897_vm2, %v1464_v17  ;;  %v1985_v17 = vld [vmem:[%s3270_s14 + $0x10] sm:$0xff] }
 0x658   : > { %2414 = vmatpush3.xpose.msk.msra.mxu1 %vm897_vm2, %v1620_v16  ;;  %2415 = vmatprep.mubr.msk.f32.mxu1 %vm2711_vm0, %v2710_v0 }
 0x659   : > { %2423 = vmatprep.subr.mxu1 %v2710_v0 }
 0x65b   : > { %2416 = vmatmul.mubr.msk.f32.vlgmr.msra.gmra.mxu1 %vm897_vm2, %v1618_v18  ;;  %v1984_v18 = vld [vmem:[%s3270_s14 + $0x8] sm:$0xff] }
 0x65c   : > { %2425 = vmatprep.mubr.msk.f32.mxu1 %vm2711_vm0, %v2710_v0  ;;  %2424 = vmatpush3.msra.mxu1 %v2260_v32 }
 0x65d   : > { %2439 = vmatprep.subr.mxu1 %v2710_v0 }
 0x717   : > { %v1537_v20 = vpop.f32.mrf.mxu1 }
 0x718   : > { %2411 = vmatmul.mubr.msk.f32.vlgmr.msra.gmra.mxu0 %vm897_vm2, %v1537_v20  ;;  %v2265_v20 = vld [vmem:[%s3269_s13] ss:$0 sm:$0xff] }
 0x719   : > { %v2407_v21 = vpop.f32.mrf.mxu1  ;;  %2420 = vmatprep.mubr.msk.f32.mxu0 %vm2711_vm0, %v2710_v0 }
 0x71b   : > { %v1691_v22 = vpop.f32.mrf.mxu1 }
 0x71c   : > { %v1695_v23 = vmul.f32 0.35355338, %v1691_v22 }
 0x71d   : > { %v2417_v24 = vpop.f32.mrf.mxu1 }
 0x71e   : > { %v1696_v26 = vsel %vm897_vm2, %v1695_v23, -inf }
 0x71f   : > { %1697 = vmax.xlane.f32.xlu0 %v1696_v26  ;;  %v2267_v26 = vld [vmem:[%s3314_s30] ss:$0 sm:$0xff]  ;;  %s3319_s30 = sld [smem:[#allocation28_spill]] }
 0x725   : > { %s3320_s3 = smov %s3319_s30 }
 0x7a8   : > { %v1698_v27 = vpop.xlane.xlu0 %1697 }
 0x7a9   : > { %v1699_v28 = vsub.f32 %v1695_v23, %v1698_v27 }
 0x7ab   : > { %v1700_v29 = vmul.f32 1.442695, %v1699_v28 }
 0x7ad   : > { %2558 = vpow2.f32 %v1700_v29 }
 0x7ba   : > { %v2559_v30 = vpop.eup %2558 }
 0x7bb   : > { %v1702_v31 = vsel %vm897_vm2, %v2559_v30, 0.0 }
 0x7bc   : > { %1703 = vadd.xlane.f32.xlu1 %v1702_v31 }
 0x7cd   : > { %1707 = vrot.lane.b32.xlu1 %v3028_v25, %s2714_s26  ;;  %s3315_s26 = sld [smem:[#allocation13_spill]] }
 0x7d3   : > { %s2271_s17 = sshll.u32 %s3315_s26, 7 }
 0x7d4   : > { %s2120_s4 = scalar_lea.hbm %s3319_s30, %s2271_s17 }
 0x7d8   : > { %v1612_v34 = vpop.f32.mrf.mxu0 }
 0x7d9   : > { %v1616_v35 = vadd.f32 %v1612_v34, %v1372_v33 }
 0x7da   : > { %v2412_v36 = vpop.f32.mrf.mxu0 }
 0x845   : > { %v1704_v37 = vpop.xlane.xlu1 %1703 }
 0x846   : > { %2560 = vrcp.f32 %v1704_v37 }
 0x849   : > { %v1708_v38 = vpop.permute.xlu1 %1707 }
 0x84a   : > { %2419 = vmatpush3.msra.mxu0 %v1708_v38 }
 0x84b   : > { %2428 = vmatprep.subr.mxu0 %v2710_v0 }
 0x853   : > { %v2561_v39 = vpop.eup %2560 }
 0x854   : > { %v1706_v40 = vmul.f32 %v2561_v39, %v2559_v30 }
 0x856   : > { %2421 = vmatmul.mubr.msk.f32.vlgmr.msra.gmra.mxu0 %vm897_vm2, %v1706_v40  ;;  %v2268_v40 = vld [vmem:[%s3317_s15] ss:$0 sm:$0xff]  ;;  %s2626_s15 = sshll.u32 %s2715_s27, 4  ;;  %s2627_s15 = int_to_ptr.vmem [resolvable:$false] %s2626_s15 }
 0x857   : > { %2436 = vmatprep.mubr.msk.f32.mxu0 %vm2711_vm0, %v2710_v0  ;;  %2429 = vmatpush3.msra.mxu0 %v1901_v54  ;;  %s2628_s1 = scalar_lea.vmem %s2627_s15, 256  ;;  %p2629_p13 = scmp.lt.s32.totalorder %s2123_s0, %s2627_s15 }
 0x858   : > { %2430 = vmatprep.subr.mxu0 %v2710_v0  ;;  %p2630_p5 = scmp.lt.s32.totalorder %s2628_s1, %s2622_s23 }
 0x859   : > { %2431 = vmatpush3.msra.mxu0 %v1900_v55 }
 0x85a   : > { %2432 = vmatprep.subr.mxu0 %v2710_v0  ;;  %p2631_p12 = por %p2630_p5, %p2629_p13 }
 0x85c   : > { %p2632_p6 = pnand %p2631_p12, %p2625_p3 }
 0x916   : > { %v1779_v25 = vpop.f32.mrf.mxu0 }
 0x917   : > { %2426 = vmatmul.mubr.msk.f32.vlgmr.msra.gmra.mxu1 %vm897_vm2, %v1779_v25 }
 0x918   : > { %v2422_v41 = vpop.f32.mrf.mxu0  ;;  %2471 = vmatprep.mubr.msk.f32.mxu1 %vm2711_vm0, %v2710_v0  ;;  %2440 = vmatpush3.msra.mxu1 %v1998_v57 }
 0x919   : > { %2441 = vmatprep.subr.mxu1 %v2710_v0  ;;  %v2269_v41 = vld [vmem:[%s3318_s16] ss:$0 sm:$0xff] }
 0x91a   : > { %2442 = vmatpush3.msra.mxu1 %v1997_v58 }
 0x91b   : > { %2443 = vmatprep.subr.mxu1 %v2710_v0 }
 0x91c   : > { %2444 = vmatpush3.msra.mxu1 %v1996_v59 }
 0x91d   : > { %2445 = vmatprep.subr.mxu1 %v2710_v0 }
 0x91e   : > { %2446 = vmatpush3.msra.mxu1 %v1995_v60 }
 0x91f   : > { %2447 = vmatprep.subr.mxu1 %v2710_v0 }
 0x920   : > { %2448 = vmatpush3.msra.mxu1 %v1994_v61 }
 0x921   : > { %2449 = vmatprep.subr.mxu1 %v2710_v0 }
 0x922   : > { %2450 = vmatpush3.msra.mxu1 %v1993_v62 }
 0x923   : > { %2451 = vmatprep.subr.mxu1 %v2710_v0 }
 0x924   : > { %2452 = vmatpush3.msra.mxu1 %v1992_v63 }
 0x925   : > { %2453 = vmatprep.subr.mxu1 %v2710_v0 }
 0x926   : > { %2454 = vmatpush3.msra.mxu1 %v1991_v1 }
 0x927   : > { %2455 = vmatprep.subr.mxu1 %v2710_v0 }
 0x928   : > { %2456 = vmatpush3.msra.mxu1 %v1990_v2 }
 0x929   : > { %2457 = vmatprep.subr.mxu1 %v2710_v0 }
 0x92a   : > { %2458 = vmatpush3.msra.mxu1 %v1989_v3 }
 0x92b   : > { %2459 = vmatprep.subr.mxu1 %v2710_v0 }
 0x92c   : > { %2460 = vmatpush3.msra.mxu1 %v1988_v4 }
 0x92d   : > { %2461 = vmatprep.subr.mxu1 %v2710_v0 }
 0x92e   : > { %2462 = vmatpush3.msra.mxu1 %v1987_v6 }
 0x92f   : > { %2463 = vmatprep.subr.mxu1 %v2710_v0 }
 0x930   : > { %2464 = vmatpush3.msra.mxu1 %v1986_v7 }
 0x931   : > { %2465 = vmatprep.subr.mxu1 %v2710_v0 }
 0x932   : > { %2466 = vmatpush3.msra.mxu1 %v1985_v17 }
 0x933   : > { %2467 = vmatprep.subr.mxu1 %v2710_v0 }
 0x934   : > { %2468 = vmatpush3.msra.mxu1 %v1984_v18 }
 0x935   : > { %2469 = vmatprep.subr.mxu1 %v2710_v0 }
 0x936   : > { %2470 = vmatpush3.msra.mxu1 %v1983_v19 }
 0x9d7   : > { %v1854_v42 = vpop.f32.mrf.mxu1 }
 0x9d8   : > { %v1858_v44 = vadd.f32 %v1854_v42, %v1616_v35 }
 0x9d9   : > { %v2427_v45 = vpop.f32.mrf.mxu1 }
 0x9da   : > { %v1866_v46 = vadd.f32 %v2262_v43, %v1858_v44 }
 0x9dc   : > { %v1867_v47 = vadd.f32 %v1866_v46, %v2956_v5  ;;  %v1899_v5 = vld [vmem:[%s3268_s12 + $0x8] sm:$0xff] }
 0x9dd   : > { %2433 = vmatpush3.msra.mxu0 %v1899_v5 }
 0x9de   : > { %v1868_v48 = vsel %vm658_vm1, %v1867_v47, 0.0  ;;  %2434 = vmatprep.subr.mxu0 %v2710_v0 }
 0x9df   : > { %1869 = vadd.xlane.f32.xlu1 %v1868_v48  ;;  %2435 = vmatpush3.msra.mxu0 %v1898_v56 }
 0xa68   : > { %v1870_v49 = vpop.xlane.xlu1 %1869 }
 0xa69   : > { %v1872_v50 = vmul.f32 0.03125, %v1870_v49 }
 0xa6b   : > { %v1873_v51 = vsub.f32 %v1867_v47, %v1872_v50 }
 0xa6d   : > { %v1874_v52 = vmul.f32 %v1873_v51, %v1873_v51 }
 0xa6f   : > { %v1875_v53 = vsel %vm658_vm1, %v1874_v52, 0.0 }
 0xa70   : > { %1876 = vadd.xlane.f32.xlu0 %v1875_v53 }
 0xaf9   : > { %v1877_v8 = vpop.xlane.xlu0 %1876 }
 0xafa   : > { %v1878_v9 = vmul.f32 0.03125, %v1877_v8 }
 0xafc   : > { %v1879_v10 = vadd.f32 1e-05, %v1878_v9 }
 0xafe   : > { %2562 = vrsqrt.f32 %v1879_v10 }
 0xb0b   : > { %v2563_v11 = vpop.eup %2562 }
 0xb0c   : > { %v1881_v13 = vmul.f32 %v2563_v11, %v1873_v51 }
 0xb0e   : > { %v1889_v15 = vmul.f32 %v2263_v12, %v1881_v13 }
 0xb10   : > { %v1897_v16 = vadd.f32 %v2264_v14, %v1889_v15 }
 0xb12   : > { %2437 = vmatmul.mubr.msk.f32.vlgmr.msra.gmra.mxu0 %vm658_vm1, %v1897_v16 }
 0xbd2   : > { %v1978_v21 = vpop.f32.mrf.mxu0 }
 0xbd3   : > { %v1979_v22 = vadd.f32 %v2265_v20, %v1978_v21 }
 0xbd4   : > { %v2438_v23 = vpop.f32.mrf.mxu0 }
 0xbd5   : > { %v1982_v24 = vmax.f32 %v1979_v22, 0.0 }
 0xbd7   : > { %2472 = vmatmul.mubr.f32.vlgmr.msra.gmra.mxu1 %v1982_v24 }
 0xc97   : > { %v2072_v27 = vpop.f32.mrf.mxu1 }
 0xc98   : > { %v2073_v28 = vadd.f32 %v2267_v26, %v2072_v27 }
 0xc99   : > { %v2473_v29 = vpop.f32.mrf.mxu1 }
 0xc9a   : > { %v2076_v30 = vadd.f32 %v2073_v28, %v1897_v16 }
 0xc9c   : > { %v2077_v0 = vsel %vm658_vm1, %v2076_v30, 0.0 }
 0xc9d   : > { %2078 = vadd.xlane.f32.xlu0 %v2077_v0 }
 0xd26   : > { %v2079_v31 = vpop.xlane.xlu0 %2078 }
 0xd27   : > { %v2080_v32 = vmul.f32 0.03125, %v2079_v31 }
 0xd29   : > { %v2081_v33 = vsub.f32 %v2076_v30, %v2080_v32 }
 0xd2b   : > { %v2082_v34 = vmul.f32 %v2081_v33, %v2081_v33 }
 0xd2d   : > { %v2083_v35 = vsel %vm658_vm1, %v2082_v34, 0.0 }
 0xd2e   : > { %2084 = vadd.xlane.f32.xlu0 %v2083_v35 }
 0xdb7   : > { %v2085_v36 = vpop.xlane.xlu0 %2084 }
 0xdb8   : > { %v2086_v37 = vmul.f32 0.03125, %v2085_v36 }
 0xdba   : > { %v2087_v38 = vadd.f32 1e-05, %v2086_v37 }
 0xdbc   : > { %2564 = vrsqrt.f32 %v2087_v38 }
 0xdc9   : > { %v2565_v39 = vpop.eup %2564 }
 0xdca   : > { %v2089_v25 = vmul.f32 %v2565_v39, %v2081_v33 }
 0xdcc   : > { %v2097_v42 = vmul.f32 %v2268_v40, %v2089_v25 }
 0xdce   : > { %v2105_v43 = vadd.f32 %v2269_v41, %v2097_v42 }
 0xdd0   : > { %2106 = vst.msk [vmem:[%s644_s24] sm:$0xff] %vm658_vm1, %v2105_v43 }
 0xdd1   : > { %2635 = shalt.err (!%p2632_p6)
}
 0xdd2   : > { %s2636_s26 = scalar_lea.hbm %s2120_s4, 128  ;;  %s2640_s2 = scalar_lea.hbm %s3320_s3, 256 }
 0xdd3   : > { %p2637_p7 = scmp.ne.s32.totalorder %s2120_s4, %s2636_s26  ;;  %p2641_p4 = scmp.lt.s32.totalorder %s2120_s4, %s3320_s3 }
 0xdd4   : > { %p2642_p10 = scmp.lt.s32.totalorder %s2640_s2, %s2636_s26 }
 0xdd5   : > { %p2638_p1 = pnand %p2637_p7, %p2862_p9 }
 0xdd6   : > { %p2643_p8 = por %p2642_p10, %p2641_p4 }
 0xdd7   : > { %p2639_p2 = pneg %p2638_p1 }
 0xdd9   : > { %p2644_p0 = pnand %p2643_p8, %p2639_p2 }
 0xddb   : > { %2647 = shalt.err (!%p2644_p0)
}
 0xddc   : > { %2478 = dma.vmem_to_hbm [thread:$0]  (%p2862_p9), %s2123_s0, 128, %s2120_s4, %s2108_s5  }
 0xddd PF: > { %s3321_s24 = sld [smem:[#allocation11_spill]]  ;;  %p3323_p3 = scmp.ge.s32.totalorder %s2706_s19, 2 }
 0xddf   : > { %p2488_p13 = pnand %p3323_p3, %p2869_p11 }
 0xde1   : > { %p2489_p5 = pneg %p2488_p13 }
 0xde3   : > { %s2134_s29 = sand.u32 1, %s3321_s24  }
 0xde4   : > { %s2135_s30 = scalar_lea.sflag [#allocation4], %s2134_s29 }
 0xde5   : > { %2681 = dma.done.wait (%p2489_p5), %s2135_s30, 128  }
 0xde6   : > { %2683 = vsyncadd (%p2489_p5), %s2135_s30, 4294967168  ;;  %s37_s19 = sadd.s32 1, %s2706_s19   ;;  %s3324_s23 = sld [smem:[#allocation12_spill]] }
 0xde7   : > { %p34_p12 = scmp.ge.s32.totalorder %s37_s19, 4   ;;  %s3325_s29 = sld [smem:[#allocation17_spill]] }
 0xde8   : > { %s3326_s30 = sld [smem:[#allocation14_spill]]  ;;  %s3328_s27 = smov %s2690_s28 }
 0xde9   : > { %s3327_s0 = sld [smem:[#allocation15_spill]]  ;;  %36 = sbr.rel (!%p34_p12) target bundleno = 19 (0x13), region = 153 }
 0xdec   : > { %s3329_s28 = smov %s3324_s23 }
 0xdee   :  { %2140 = vsyncpa [#allocation3], 1 }
 0xdef   :  { %2142 = vsyncpa [#allocation3 + $0x1], 1 }
 0xdf0   :  { %2143 = vsyncpa [#allocation6], 1 }
 0xdf1   :  { %2145 = vsyncpa [#allocation6 + $0x1], 1 }
 0xdf2   :  { %2146 = vsyncpa [#allocation4], 1 }
 0xdf3   :  { %2148 = vsyncpa [#allocation4 + $0x1], 1 }

</bundles_post_ra>
